<compile_context>
chip_gen: v7x
topology: tpu7x:2x2x1
jax: 0.10.0
libtpu: 0.0.40
codegen_flags: <defaults>
</compile_context>

<pallas_src>
import jax
import jax.numpy as jnp
from jax.experimental import pallas as pl
from jax.experimental.pallas import tpu as pltpu


# ----------------------------------------------------------------------------
# Window bookkeeping (static, mirrors F.max_pool2d semantics exactly).
# ----------------------------------------------------------------------------
def _ceil_div(a, b):
    return -(-a // b)


def _round_up(x, m):
    return _ceil_div(x, m) * m


def _total_num_bins(levels):
    return sum(i ** 2 for i in range(1, levels + 1))


def _make_windows(H, W, levels):
    """Static (r0, r1, c0, c1) windows in F.max_pool2d flattening order."""
    wins = [(0, H, 0, W)]  # level 1: kernel == (H, W) -> single window
    for i in range(2, levels + 1):
        kh, kw = _ceil_div(H, i), _ceil_div(W, i)
        sh, sw = H // i, W // i
        if sh <= 0 or sw <= 0:
            raise ValueError(
                f"Sp_pooling2D: spatial size ({H},{W}) too small for level {i} "
                "(stride would be 0; PyTorch max_pool2d rejects this too).")
        oh = (H - kh) // sh + 1
        ow = (W - kw) // sw + 1
        for r in range(oh):
            for c in range(ow):
                wins.append((r * sh, r * sh + kh, c * sw, c * sw + kw))
    return wins


# ----------------------------------------------------------------------------
# Tiling / VMEM budgeting.
# ----------------------------------------------------------------------------
def _vmem_capacity_bytes():
    """Per-core VMEM capacity; conservative fallback if the query fails."""
    try:
        cap = int(pltpu.get_tpu_info().vmem_capacity_bytes)
        if cap >= 32 * 1024 * 1024:
            return cap
    except Exception:
        pass
    return 64 * 1024 * 1024  # v7x per-TensorCore VMEM (smallest generation)


def _divisors(n):
    out = set()
    i = 1
    while i * i <= n:
        if n % i == 0:
            out.add(i)
            out.add(n // i)
        i += 1
    return sorted(out)


def _td_candidates(d):
    """Channel tiles that satisfy the (8,128) lane constraint on the output
    block (last dim must be a multiple of 128 or the full channel axis)."""
    cands = {d}
    for t in _divisors(d):
        if t % 128 == 0:
            cands.add(t)
    return sorted(cands)  # ascending


def _in_block_bytes(tb, td, H, W, itemsize, nchw_direct):
    """VMEM footprint of one input block, including (8,128) layout padding."""
    if nchw_direct:   # block (tb, td, H, W): (H, W) are the tiled dims
        return tb * td * _round_up(H, 8) * _round_up(W, 128) * itemsize
    # channels-last block (tb, H, W, td): (W, td) are the tiled dims
    return tb * H * _round_up(W, 8) * _round_up(td, 128) * itemsize


def _choose_tiles(b, d, H, W, itemsize, budget, nchw_direct):
    tds = _td_candidates(d)

    # Largest channel tile whose single block fits the budget (else smallest).
    td = tds[0]
    for cand in tds:
        if _in_block_bytes(1, cand, H, W, itemsize, nchw_direct) <= budget:
            td = cand

    # Fold batch into the block while it still fits (amortizes per-step cost).
    tb = 1
    for cand in _divisors(b):
        if _in_block_bytes(cand, td, H, W, itemsize, nchw_direct) <= budget:
            tb = cand

    # v7x has 2 TensorCores: keep at least 2 steps on the parallel grid.
    def steps(tb_, td_):
        return (b // tb_) * (d // td_)

    while steps(tb, td) < 2:
        if tb > 1:
            tb = max(x for x in _divisors(b) if x < tb)
        else:
            smaller = [x for x in tds if x < td]
            if not smaller:
                break
            td = smaller[-1]
    return tb, td


# ----------------------------------------------------------------------------
# Kernels.
# ----------------------------------------------------------------------------
def _spp_kernel_cl_factory(windows):
    """Channels-last path: x_ref (tb, H, W, td), o_ref (tb, n_out, td).
    Channels ride the 128-wide lane axis; window maxes are leading/sublane
    reductions and every store is a lane-dense row."""
    def kernel(x_ref, o_ref):
        for bin_idx, (r0, r1, c0, c1) in enumerate(windows):   # static unroll
            w = x_ref[:, r0:r1, c0:c1, :]                      # (tb, kh, kw, td)
            m = jnp.max(w, axis=(1, 2))                        # (tb, td)
            o_ref[:, bin_idx, :] = m.astype(o_ref.dtype)       # lane-dense row
    return kernel


def _spp_kernel_nchw_factory(windows):
    """NCHW-direct path (no input transpose): x_ref (tb, td, H, W),
    o_ref (tb, n_out, td). Per-window reduce is a cross-sublane/lane (XLU)
    reduce per channel; output is only ~tbins elements per channel so this
    compute rides under the HBM DMA for W >= ~128."""
    def kernel(x_ref, o_ref):
        for bin_idx, (r0, r1, c0, c1) in enumerate(windows):   # static unroll
            w = x_ref[:, :, r0:r1, c0:c1]                      # (tb, td, kh, kw)
            m = jnp.max(w, axis=(2, 3))                        # (tb, td)
            o_ref[:, bin_idx, :] = m.astype(o_ref.dtype)       # lane-dense row
    return kernel


# ----------------------------------------------------------------------------
# Wrapper.
# ----------------------------------------------------------------------------
def sp_pooling2d(X, levels=4):
    b, d, H, W = X.shape
    itemsize = jnp.dtype(X.dtype).itemsize
    tbins = _total_num_bins(levels)

    windows = _make_windows(H, W, levels)[:tbins]   # matches out[:, :, :tbins]
    n_out = len(windows)

    # NCHW-direct only pays off when W fills the lane axis; for small W the
    # channels-last layout (with its input transpose) is still the fast path.
    nchw_direct = W >= 128

    cap = _vmem_capacity_bytes()
    budget = min(cap // 8, 12 * 1024 * 1024)        # per single input block
    tb, td = _choose_tiles(b, d, H, W, itemsize, budget, nchw_direct)
    assert b % tb == 0 and d % td == 0, (b, tb, d, td)

    in_block = _in_block_bytes(tb, td, H, W, itemsize, nchw_direct)
    out_block = tb * _round_up(n_out, 8) * _round_up(td, 128) * itemsize
    needed = 2 * in_block + 2 * out_block + (2 << 20)     # dbl-buffer + slack
    vmem_limit = int(min(max(needed, 32 << 20), cap - (4 << 20)))

    win_area = sum((r1 - r0) * (c1 - c0) for r0, r1, c0, c1 in windows)
    cost = pl.CostEstimate(
        flops=b * d * win_area,
        transcendentals=0,
        bytes_accessed=b * d * H * W * itemsize + b * d * n_out * itemsize)

    if nchw_direct:
        kernel = _spp_kernel_nchw_factory(windows)
        x_in = X                                           # no transpose at all
        in_spec = pl.BlockSpec((tb, td, H, W), lambda i, j: (i, j, 0, 0))
    else:
        kernel = _spp_kernel_cl_factory(windows)
        x_in = jnp.transpose(X, (0, 2, 3, 1))              # (b, H, W, d)
        in_spec = pl.BlockSpec((tb, H, W, td), lambda i, j: (i, 0, 0, j))

    out_cl = pl.pallas_call(
        kernel,
        out_shape=jax.ShapeDtypeStruct((b, n_out, d), X.dtype),
        grid_spec=pltpu.PrefetchScalarGridSpec(
            num_scalar_prefetch=0,
            grid=(b // tb, d // td),
            in_specs=[in_spec],
            out_specs=pl.BlockSpec((tb, n_out, td), lambda i, j: (i, 0, j)),
        ),
        compiler_params=pltpu.CompilerParams(
            dimension_semantics=("parallel", "parallel"),
            vmem_limit_bytes=vmem_limit,
        ),
        cost_estimate=cost,
    )(x_in)

    # Tiny (b, d, ~30) output transpose back to the module's layout.
    return jnp.transpose(out_cl, (0, 2, 1))


# ----------------------------------------------------------------------------
# Independent pure-JAX reference mirroring F.max_pool2d semantics.
# ----------------------------------------------------------------------------
def _reference_spp(X, levels=4):
    b, d, H, W = X.shape
    tbins = _total_num_bins(levels)
    if jnp.issubdtype(X.dtype, jnp.floating):
        init = jnp.array(-jnp.inf, X.dtype)
    else:
        init = jnp.array(jnp.iinfo(X.dtype).min, X.dtype)

    def maxpool(x, k, s):
        return jax.lax.reduce_window(
            x, init, jax.lax.max,
            window_dimensions=(1, 1, k[0], k[1]),
            window_strides=(1, 1, s[0], s[1]),
            padding="VALID")

    outs = [maxpool(X, (H, W), (H, W)).reshape(b, d, -1)]
    for i in range(2, levels + 1):
        kh, kw = _ceil_div(H, i), _ceil_div(W, i)
        sh, sw = H // i, W // i
        outs.append(maxpool(X, (kh, kw), (sh, sw)).reshape(b, d, -1))
    out = jnp.concatenate(outs, axis=-1)
    return out[:, :, :tbins].astype(X.dtype)


if __name__ == "__main__":
    key = jax.random.PRNGKey(0)
    levels = 4
    tbins = _total_num_bins(levels)

    checks = [
        (2, 4, 16, 16),     # module-sized demo: channels-last path, grid (2,1)
        (4, 256, 12, 20),   # channels-last path with batch folding (tb=2)
        (2, 8, 16, 128),    # NCHW-direct path (W >= 128): no input transpose
    ]
    for idx, (b, d, H, W) in enumerate(checks):
        key, sub = jax.random.split(key)
        X = jax.random.normal(sub, (b, d, H, W), dtype=jnp.float32)

        out = jax.block_until_ready(sp_pooling2d(X, levels=levels))
        ref = _reference_spp(X, levels=levels)

        assert out.shape == (b, d, tbins), (out.shape, (b, d, tbins))
        assert jnp.allclose(out, ref, atol=1e-6), f"mismatch vs reference, case {idx}"

    print("KERNEL_OK")
</pallas_src>

<mosaic_0001>
module attributes {stable_mosaic.version = 11 : i64} {
  func.func @kernel(%arg0: i32, %arg1: i32, %arg2: memref<1x16x16x4xf32, #tpu.memory_space<vmem>>, %arg3: memref<1x30x4xf32, #tpu.memory_space<vmem>>) attributes {dimension_semantics = [#tpu.dimension_semantics<parallel>, #tpu.dimension_semantics<parallel>], iteration_bounds = array<i64: 2, 1>, scalar_prefetch = 0 : i64, scratch_operands = 0 : i64, tpu.core_type = #tpu.core_type<tc>, window_params = [{transform_indices = @transform_0, window_bounds = array<i64: 1, 16, 16, 4>}, {transform_indices = @transform_1, window_bounds = array<i64: 1, 30, 4>}]} {
    %c0 = arith.constant 0 : index
    %c0_0 = arith.constant 0 : index
    %c0_1 = arith.constant 0 : index
    %c0_2 = arith.constant 0 : index
    %0 = vector.load %arg2[%c0, %c0_0, %c0_1, %c0_2] : memref<1x16x16x4xf32, #tpu.memory_space<vmem>>, vector<1x16x16x4xf32>
    %cst = arith.constant dense<0xFF800000> : vector<1x4xf32>
    %1 = vector.multi_reduction <maximumf>, %0, %cst [1, 2] : vector<1x16x16x4xf32> to vector<1x4xf32>
    %c0_3 = arith.constant 0 : index
    %c0_4 = arith.constant 0 : index
    %c0_5 = arith.constant 0 : index
    %2 = vector.load %arg3[%c0_3, %c0_4, %c0_5] : memref<1x30x4xf32, #tpu.memory_space<vmem>>, vector<1x1x4xf32>
    %3 = vector.shape_cast %2 : vector<1x1x4xf32> to vector<1x4xf32>
    %4 = vector.shape_cast %1 : vector<1x4xf32> to vector<1x1x4xf32>
    tpu.vector_store %arg3[%c0_3, %c0_4, %c0_5], %4 {strides = array<i32>} : memref<1x30x4xf32, #tpu.memory_space<vmem>>, vector<1x1x4xf32>,
    %c0_6 = arith.constant 0 : index
    %c0_7 = arith.constant 0 : index
    %c0_8 = arith.constant 0 : index
    %c0_9 = arith.constant 0 : index
    %5 = vector.load %arg2[%c0_6, %c0_7, %c0_8, %c0_9] : memref<1x16x16x4xf32, #tpu.memory_space<vmem>>, vector<1x8x8x4xf32>
    %cst_10 = arith.constant dense<0xFF800000> : vector<1x4xf32>
    %6 = vector.multi_reduction <maximumf>, %5, %cst_10 [1, 2] : vector<1x8x8x4xf32> to vector<1x4xf32>
    %c0_11 = arith.constant 0 : index
    %c1 = arith.constant 1 : index
    %c0_12 = arith.constant 0 : index
    %7 = vector.load %arg3[%c0_11, %c1, %c0_12] : memref<1x30x4xf32, #tpu.memory_space<vmem>>, vector<1x1x4xf32>
    %8 = vector.shape_cast %7 : vector<1x1x4xf32> to vector<1x4xf32>
    %9 = vector.shape_cast %6 : vector<1x4xf32> to vector<1x1x4xf32>
    tpu.vector_store %arg3[%c0_11, %c1, %c0_12], %9 {strides = array<i32>} : memref<1x30x4xf32, #tpu.memory_space<vmem>>, vector<1x1x4xf32>,
    %c0_13 = arith.constant 0 : index
    %c0_14 = arith.constant 0 : index
    %c8 = arith.constant 8 : index
    %c0_15 = arith.constant 0 : index
    %10 = vector.load %arg2[%c0_13, %c0_14, %c8, %c0_15] : memref<1x16x16x4xf32, #tpu.memory_space<vmem>>, vector<1x8x8x4xf32>
    %cst_16 = arith.constant dense<0xFF800000> : vector<1x4xf32>
    %11 = vector.multi_reduction <maximumf>, %10, %cst_16 [1, 2] : vector<1x8x8x4xf32> to vector<1x4xf32>
    %c0_17 = arith.constant 0 : index
    %c2 = arith.constant 2 : index
    %c0_18 = arith.constant 0 : index
    %12 = vector.load %arg3[%c0_17, %c2, %c0_18] : memref<1x30x4xf32, #tpu.memory_space<vmem>>, vector<1x1x4xf32>
    %13 = vector.shape_cast %12 : vector<1x1x4xf32> to vector<1x4xf32>
    %14 = vector.shape_cast %11 : vector<1x4xf32> to vector<1x1x4xf32>
    tpu.vector_store %arg3[%c0_17, %c2, %c0_18], %14 {strides = array<i32>} : memref<1x30x4xf32, #tpu.memory_space<vmem>>, vector<1x1x4xf32>,
    %c0_19 = arith.constant 0 : index
    %c8_20 = arith.constant 8 : index
    %c0_21 = arith.constant 0 : index
    %c0_22 = arith.constant 0 : index
    %15 = vector.load %arg2[%c0_19, %c8_20, %c0_21, %c0_22] : memref<1x16x16x4xf32, #tpu.memory_space<vmem>>, vector<1x8x8x4xf32>
    %cst_23 = arith.constant dense<0xFF800000> : vector<1x4xf32>
    %16 = vector.multi_reduction <maximumf>, %15, %cst_23 [1, 2] : vector<1x8x8x4xf32> to vector<1x4xf32>
    %c0_24 = arith.constant 0 : index
    %c3 = arith.constant 3 : index
    %c0_25 = arith.constant 0 : index
    %17 = vector.load %arg3[%c0_24, %c3, %c0_25] : memref<1x30x4xf32, #tpu.memory_space<vmem>>, vector<1x1x4xf32>
    %18 = vector.shape_cast %17 : vector<1x1x4xf32> to vector<1x4xf32>
    %19 = vector.shape_cast %16 : vector<1x4xf32> to vector<1x1x4xf32>
    tpu.vector_store %arg3[%c0_24, %c3, %c0_25], %19 {strides = array<i32>} : memref<1x30x4xf32, #tpu.memory_space<vmem>>, vector<1x1x4xf32>,
    %c0_26 = arith.constant 0 : index
    %c8_27 = arith.constant 8 : index
    %c8_28 = arith.constant 8 : index
    %c0_29 = arith.constant 0 : index
    %20 = vector.load %arg2[%c0_26, %c8_27, %c8_28, %c0_29] : memref<1x16x16x4xf32, #tpu.memory_space<vmem>>, vector<1x8x8x4xf32>
    %cst_30 = arith.constant dense<0xFF800000> : vector<1x4xf32>
    %21 = vector.multi_reduction <maximumf>, %20, %cst_30 [1, 2] : vector<1x8x8x4xf32> to vector<1x4xf32>
    %c0_31 = arith.constant 0 : index
    %c4 = arith.constant 4 : index
    %c0_32 = arith.constant 0 : index
    %22 = vector.load %arg3[%c0_31, %c4, %c0_32] : memref<1x30x4xf32, #tpu.memory_space<vmem>>, vector<1x1x4xf32>
    %23 = vector.shape_cast %22 : vector<1x1x4xf32> to vector<1x4xf32>
    %24 = vector.shape_cast %21 : vector<1x4xf32> to vector<1x1x4xf32>
    tpu.vector_store %arg3[%c0_31, %c4, %c0_32], %24 {strides = array<i32>} : memref<1x30x4xf32, #tpu.memory_space<vmem>>, vector<1x1x4xf32>,
    %c0_33 = arith.constant 0 : index
    %c0_34 = arith.constant 0 : index
    %c0_35 = arith.constant 0 : index
    %c0_36 = arith.constant 0 : index
    %25 = vector.load %arg2[%c0_33, %c0_34, %c0_35, %c0_36] : memref<1x16x16x4xf32, #tpu.memory_space<vmem>>, vector<1x6x6x4xf32>
    %cst_37 = arith.constant dense<0xFF800000> : vector<1x4xf32>
    %26 = vector.multi_reduction <maximumf>, %25, %cst_37 [1, 2] : vector<1x6x6x4xf32> to vector<1x4xf32>
    %c0_38 = arith.constant 0 : index
    %c5 = arith.constant 5 : index
    %c0_39 = arith.constant 0 : index
    %27 = vector.load %arg3[%c0_38, %c5, %c0_39] : memref<1x30x4xf32, #tpu.memory_space<vmem>>, vector<1x1x4xf32>
    %28 = vector.shape_cast %27 : vector<1x1x4xf32> to vector<1x4xf32>
    %29 = vector.shape_cast %26 : vector<1x4xf32> to vector<1x1x4xf32>
    tpu.vector_store %arg3[%c0_38, %c5, %c0_39], %29 {strides = array<i32>} : memref<1x30x4xf32, #tpu.memory_space<vmem>>, vector<1x1x4xf32>,
    %c0_40 = arith.constant 0 : index
    %c0_41 = arith.constant 0 : index
    %c5_42 = arith.constant 5 : index
    %c0_43 = arith.constant 0 : index
    %30 = vector.load %arg2[%c0_40, %c0_41, %c5_42, %c0_43] : memref<1x16x16x4xf32, #tpu.memory_space<vmem>>, vector<1x6x6x4xf32>
    %cst_44 = arith.constant dense<0xFF800000> : vector<1x4xf32>
    %31 = vector.multi_reduction <maximumf>, %30, %cst_44 [1, 2] : vector<1x6x6x4xf32> to vector<1x4xf32>
    %c0_45 = arith.constant 0 : index
    %c6 = arith.constant 6 : index
    %c0_46 = arith.constant 0 : index
    %32 = vector.load %arg3[%c0_45, %c6, %c0_46] : memref<1x30x4xf32, #tpu.memory_space<vmem>>, vector<1x1x4xf32>
    %33 = vector.shape_cast %32 : vector<1x1x4xf32> to vector<1x4xf32>
    %34 = vector.shape_cast %31 : vector<1x4xf32> to vector<1x1x4xf32>
    tpu.vector_store %arg3[%c0_45, %c6, %c0_46], %34 {strides = array<i32>} : memref<1x30x4xf32, #tpu.memory_space<vmem>>, vector<1x1x4xf32>,
    %c0_47 = arith.constant 0 : index
    %c0_48 = arith.constant 0 : index
    %c10 = arith.constant 10 : index
    %c0_49 = arith.constant 0 : index
    %35 = vector.load %arg2[%c0_47, %c0_48, %c10, %c0_49] : memref<1x16x16x4xf32, #tpu.memory_space<vmem>>, vector<1x6x6x4xf32>
    %cst_50 = arith.constant dense<0xFF800000> : vector<1x4xf32>
    %36 = vector.multi_reduction <maximumf>, %35, %cst_50 [1, 2] : vector<1x6x6x4xf32> to vector<1x4xf32>
    %c0_51 = arith.constant 0 : index
    %c7 = arith.constant 7 : index
    %c0_52 = arith.constant 0 : index
    %37 = vector.load %arg3[%c0_51, %c7, %c0_52] : memref<1x30x4xf32, #tpu.memory_space<vmem>>, vector<1x1x4xf32>
    %38 = vector.shape_cast %37 : vector<1x1x4xf32> to vector<1x4xf32>
    %39 = vector.shape_cast %36 : vector<1x4xf32> to vector<1x1x4xf32>
    tpu.vector_store %arg3[%c0_51, %c7, %c0_52], %39 {strides = array<i32>} : memref<1x30x4xf32, #tpu.memory_space<vmem>>, vector<1x1x4xf32>,
    %c0_53 = arith.constant 0 : index
    %c5_54 = arith.constant 5 : index
    %c0_55 = arith.constant 0 : index
    %c0_56 = arith.constant 0 : index
    %40 = vector.load %arg2[%c0_53, %c5_54, %c0_55, %c0_56] : memref<1x16x16x4xf32, #tpu.memory_space<vmem>>, vector<1x6x6x4xf32>
    %cst_57 = arith.constant dense<0xFF800000> : vector<1x4xf32>
    %41 = vector.multi_reduction <maximumf>, %40, %cst_57 [1, 2] : vector<1x6x6x4xf32> to vector<1x4xf32>
    %c0_58 = arith.constant 0 : index
    %c8_59 = arith.constant 8 : index
    %c0_60 = arith.constant 0 : index
    %42 = vector.load %arg3[%c0_58, %c8_59, %c0_60] : memref<1x30x4xf32, #tpu.memory_space<vmem>>, vector<1x1x4xf32>
    %43 = vector.shape_cast %42 : vector<1x1x4xf32> to vector<1x4xf32>
    %44 = vector.shape_cast %41 : vector<1x4xf32> to vector<1x1x4xf32>
    tpu.vector_store %arg3[%c0_58, %c8_59, %c0_60], %44 {strides = array<i32>} : memref<1x30x4xf32, #tpu.memory_space<vmem>>, vector<1x1x4xf32>,
    %c0_61 = arith.constant 0 : index
    %c5_62 = arith.constant 5 : index
    %c5_63 = arith.constant 5 : index
    %c0_64 = arith.constant 0 : index
    %45 = vector.load %arg2[%c0_61, %c5_62, %c5_63, %c0_64] : memref<1x16x16x4xf32, #tpu.memory_space<vmem>>, vector<1x6x6x4xf32>
    %cst_65 = arith.constant dense<0xFF800000> : vector<1x4xf32>
    %46 = vector.multi_reduction <maximumf>, %45, %cst_65 [1, 2] : vector<1x6x6x4xf32> to vector<1x4xf32>
    %c0_66 = arith.constant 0 : index
    %c9 = arith.constant 9 : index
    %c0_67 = arith.constant 0 : index
    %47 = vector.load %arg3[%c0_66, %c9, %c0_67] : memref<1x30x4xf32, #tpu.memory_space<vmem>>, vector<1x1x4xf32>
    %48 = vector.shape_cast %47 : vector<1x1x4xf32> to vector<1x4xf32>
    %49 = vector.shape_cast %46 : vector<1x4xf32> to vector<1x1x4xf32>
    tpu.vector_store %arg3[%c0_66, %c9, %c0_67], %49 {strides = array<i32>} : memref<1x30x4xf32, #tpu.memory_space<vmem>>, vector<1x1x4xf32>,
    %c0_68 = arith.constant 0 : index
    %c5_69 = arith.constant 5 : index
    %c10_70 = arith.constant 10 : index
    %c0_71 = arith.constant 0 : index
    %50 = vector.load %arg2[%c0_68, %c5_69, %c10_70, %c0_71] : memref<1x16x16x4xf32, #tpu.memory_space<vmem>>, vector<1x6x6x4xf32>
    %cst_72 = arith.constant dense<0xFF800000> : vector<1x4xf32>
    %51 = vector.multi_reduction <maximumf>, %50, %cst_72 [1, 2] : vector<1x6x6x4xf32> to vector<1x4xf32>
    %c0_73 = arith.constant 0 : index
    %c10_74 = arith.constant 10 : index
    %c0_75 = arith.constant 0 : index
    %52 = vector.load %arg3[%c0_73, %c10_74, %c0_75] : memref<1x30x4xf32, #tpu.memory_space<vmem>>, vector<1x1x4xf32>
    %53 = vector.shape_cast %52 : vector<1x1x4xf32> to vector<1x4xf32>
    %54 = vector.shape_cast %51 : vector<1x4xf32> to vector<1x1x4xf32>
    tpu.vector_store %arg3[%c0_73, %c10_74, %c0_75], %54 {strides = array<i32>} : memref<1x30x4xf32, #tpu.memory_space<vmem>>, vector<1x1x4xf32>,
    %c0_76 = arith.constant 0 : index
    %c10_77 = arith.constant 10 : index
    %c0_78 = arith.constant 0 : index
    %c0_79 = arith.constant 0 : index
    %55 = vector.load %arg2[%c0_76, %c10_77, %c0_78, %c0_79] : memref<1x16x16x4xf32, #tpu.memory_space<vmem>>, vector<1x6x6x4xf32>
    %cst_80 = arith.constant dense<0xFF800000> : vector<1x4xf32>
    %56 = vector.multi_reduction <maximumf>, %55, %cst_80 [1, 2] : vector<1x6x6x4xf32> to vector<1x4xf32>
    %c0_81 = arith.constant 0 : index
    %c11 = arith.constant 11 : index
    %c0_82 = arith.constant 0 : index
    %57 = vector.load %arg3[%c0_81, %c11, %c0_82] : memref<1x30x4xf32, #tpu.memory_space<vmem>>, vector<1x1x4xf32>
    %58 = vector.shape_cast %57 : vector<1x1x4xf32> to vector<1x4xf32>
    %59 = vector.shape_cast %56 : vector<1x4xf32> to vector<1x1x4xf32>
    tpu.vector_store %arg3[%c0_81, %c11, %c0_82], %59 {strides = array<i32>} : memref<1x30x4xf32, #tpu.memory_space<vmem>>, vector<1x1x4xf32>,
    %c0_83 = arith.constant 0 : index
    %c10_84 = arith.constant 10 : index
    %c5_85 = arith.constant 5 : index
    %c0_86 = arith.constant 0 : index
    %60 = vector.load %arg2[%c0_83, %c10_84, %c5_85, %c0_86] : memref<1x16x16x4xf32, #tpu.memory_space<vmem>>, vector<1x6x6x4xf32>
    %cst_87 = arith.constant dense<0xFF800000> : vector<1x4xf32>
    %61 = vector.multi_reduction <maximumf>, %60, %cst_87 [1, 2] : vector<1x6x6x4xf32> to vector<1x4xf32>
    %c0_88 = arith.constant 0 : index
    %c12 = arith.constant 12 : index
    %c0_89 = arith.constant 0 : index
    %62 = vector.load %arg3[%c0_88, %c12, %c0_89] : memref<1x30x4xf32, #tpu.memory_space<vmem>>, vector<1x1x4xf32>
    %63 = vector.shape_cast %62 : vector<1x1x4xf32> to vector<1x4xf32>
    %64 = vector.shape_cast %61 : vector<1x4xf32> to vector<1x1x4xf32>
    tpu.vector_store %arg3[%c0_88, %c12, %c0_89], %64 {strides = array<i32>} : memref<1x30x4xf32, #tpu.memory_space<vmem>>, vector<1x1x4xf32>,
    %c0_90 = arith.constant 0 : index
    %c10_91 = arith.constant 10 : index
    %c10_92 = arith.constant 10 : index
    %c0_93 = arith.constant 0 : index
    %65 = vector.load %arg2[%c0_90, %c10_91, %c10_92, %c0_93] : memref<1x16x16x4xf32, #tpu.memory_space<vmem>>, vector<1x6x6x4xf32>
    %cst_94 = arith.constant dense<0xFF800000> : vector<1x4xf32>
    %66 = vector.multi_reduction <maximumf>, %65, %cst_94 [1, 2] : vector<1x6x6x4xf32> to vector<1x4xf32>
    %c0_95 = arith.constant 0 : index
    %c13 = arith.constant 13 : index
    %c0_96 = arith.constant 0 : index
    %67 = vector.load %arg3[%c0_95, %c13, %c0_96] : memref<1x30x4xf32, #tpu.memory_space<vmem>>, vector<1x1x4xf32>
    %68 = vector.shape_cast %67 : vector<1x1x4xf32> to vector<1x4xf32>
    %69 = vector.shape_cast %66 : vector<1x4xf32> to vector<1x1x4xf32>
    tpu.vector_store %arg3[%c0_95, %c13, %c0_96], %69 {strides = array<i32>} : memref<1x30x4xf32, #tpu.memory_space<vmem>>, vector<1x1x4xf32>,
    %c0_97 = arith.constant 0 : index
    %c0_98 = arith.constant 0 : index
    %c0_99 = arith.constant 0 : index
    %c0_100 = arith.constant 0 : index
    %70 = vector.load %arg2[%c0_97, %c0_98, %c0_99, %c0_100] : memref<1x16x16x4xf32, #tpu.memory_space<vmem>>, vector<1x4x4x4xf32>
    %cst_101 = arith.constant dense<0xFF800000> : vector<1x4xf32>
    %71 = vector.multi_reduction <maximumf>, %70, %cst_101 [1, 2] : vector<1x4x4x4xf32> to vector<1x4xf32>
    %c0_102 = arith.constant 0 : index
    %c14 = arith.constant 14 : index
    %c0_103 = arith.constant 0 : index
    %72 = vector.load %arg3[%c0_102, %c14, %c0_103] : memref<1x30x4xf32, #tpu.memory_space<vmem>>, vector<1x1x4xf32>
    %73 = vector.shape_cast %72 : vector<1x1x4xf32> to vector<1x4xf32>
    %74 = vector.shape_cast %71 : vector<1x4xf32> to vector<1x1x4xf32>
    tpu.vector_store %arg3[%c0_102, %c14, %c0_103], %74 {strides = array<i32>} : memref<1x30x4xf32, #tpu.memory_space<vmem>>, vector<1x1x4xf32>,
    %c0_104 = arith.constant 0 : index
    %c0_105 = arith.constant 0 : index
    %c4_106 = arith.constant 4 : index
    %c0_107 = arith.constant 0 : index
    %75 = vector.load %arg2[%c0_104, %c0_105, %c4_106, %c0_107] : memref<1x16x16x4xf32, #tpu.memory_space<vmem>>, vector<1x4x4x4xf32>
    %cst_108 = arith.constant dense<0xFF800000> : vector<1x4xf32>
    %76 = vector.multi_reduction <maximumf>, %75, %cst_108 [1, 2] : vector<1x4x4x4xf32> to vector<1x4xf32>
    %c0_109 = arith.constant 0 : index
    %c15 = arith.constant 15 : index
    %c0_110 = arith.constant 0 : index
    %77 = vector.load %arg3[%c0_109, %c15, %c0_110] : memref<1x30x4xf32, #tpu.memory_space<vmem>>, vector<1x1x4xf32>
    %78 = vector.shape_cast %77 : vector<1x1x4xf32> to vector<1x4xf32>
    %79 = vector.shape_cast %76 : vector<1x4xf32> to vector<1x1x4xf32>
    tpu.vector_store %arg3[%c0_109, %c15, %c0_110], %79 {strides = array<i32>} : memref<1x30x4xf32, #tpu.memory_space<vmem>>, vector<1x1x4xf32>,
    %c0_111 = arith.constant 0 : index
    %c0_112 = arith.constant 0 : index
    %c8_113 = arith.constant 8 : index
    %c0_114 = arith.constant 0 : index
    %80 = vector.load %arg2[%c0_111, %c0_112, %c8_113, %c0_114] : memref<1x16x16x4xf32, #tpu.memory_space<vmem>>, vector<1x4x4x4xf32>
    %cst_115 = arith.constant dense<0xFF800000> : vector<1x4xf32>
    %81 = vector.multi_reduction <maximumf>, %80, %cst_115 [1, 2] : vector<1x4x4x4xf32> to vector<1x4xf32>
    %c0_116 = arith.constant 0 : index
    %c16 = arith.constant 16 : index
    %c0_117 = arith.constant 0 : index
    %82 = vector.load %arg3[%c0_116, %c16, %c0_117] : memref<1x30x4xf32, #tpu.memory_space<vmem>>, vector<1x1x4xf32>
    %83 = vector.shape_cast %82 : vector<1x1x4xf32> to vector<1x4xf32>
    %84 = vector.shape_cast %81 : vector<1x4xf32> to vector<1x1x4xf32>
    tpu.vector_store %arg3[%c0_116, %c16, %c0_117], %84 {strides = array<i32>} : memref<1x30x4xf32, #tpu.memory_space<vmem>>, vector<1x1x4xf32>,
    %c0_118 = arith.constant 0 : index
    %c0_119 = arith.constant 0 : index
    %c12_120 = arith.constant 12 : index
    %c0_121 = arith.constant 0 : index
    %85 = vector.load %arg2[%c0_118, %c0_119, %c12_120, %c0_121] : memref<1x16x16x4xf32, #tpu.memory_space<vmem>>, vector<1x4x4x4xf32>
    %cst_122 = arith.constant dense<0xFF800000> : vector<1x4xf32>
    %86 = vector.multi_reduction <maximumf>, %85, %cst_122 [1, 2] : vector<1x4x4x4xf32> to vector<1x4xf32>
    %c0_123 = arith.constant 0 : index
    %c17 = arith.constant 17 : index
    %c0_124 = arith.constant 0 : index
    %87 = vector.load %arg3[%c0_123, %c17, %c0_124] : memref<1x30x4xf32, #tpu.memory_space<vmem>>, vector<1x1x4xf32>
    %88 = vector.shape_cast %87 : vector<1x1x4xf32> to vector<1x4xf32>
    %89 = vector.shape_cast %86 : vector<1x4xf32> to vector<1x1x4xf32>
    tpu.vector_store %arg3[%c0_123, %c17, %c0_124], %89 {strides = array<i32>} : memref<1x30x4xf32, #tpu.memory_space<vmem>>, vector<1x1x4xf32>,
    %c0_125 = arith.constant 0 : index
    %c4_126 = arith.constant 4 : index
    %c0_127 = arith.constant 0 : index
    %c0_128 = arith.constant 0 : index
    %90 = vector.load %arg2[%c0_125, %c4_126, %c0_127, %c0_128] : memref<1x16x16x4xf32, #tpu.memory_space<vmem>>, vector<1x4x4x4xf32>
    %cst_129 = arith.constant dense<0xFF800000> : vector<1x4xf32>
    %91 = vector.multi_reduction <maximumf>, %90, %cst_129 [1, 2] : vector<1x4x4x4xf32> to vector<1x4xf32>
    %c0_130 = arith.constant 0 : index
    %c18 = arith.constant 18 : index
    %c0_131 = arith.constant 0 : index
    %92 = vector.load %arg3[%c0_130, %c18, %c0_131] : memref<1x30x4xf32, #tpu.memory_space<vmem>>, vector<1x1x4xf32>
    %93 = vector.shape_cast %92 : vector<1x1x4xf32> to vector<1x4xf32>
    %94 = vector.shape_cast %91 : vector<1x4xf32> to vector<1x1x4xf32>
    tpu.vector_store %arg3[%c0_130, %c18, %c0_131], %94 {strides = array<i32>} : memref<1x30x4xf32, #tpu.memory_space<vmem>>, vector<1x1x4xf32>,
    %c0_132 = arith.constant 0 : index
    %c4_133 = arith.constant 4 : index
    %c4_134 = arith.constant 4 : index
    %c0_135 = arith.constant 0 : index
    %95 = vector.load %arg2[%c0_132, %c4_133, %c4_134, %c0_135] : memref<1x16x16x4xf32, #tpu.memory_space<vmem>>, vector<1x4x4x4xf32>
    %cst_136 = arith.constant dense<0xFF800000> : vector<1x4xf32>
    %96 = vector.multi_reduction <maximumf>, %95, %cst_136 [1, 2] : vector<1x4x4x4xf32> to vector<1x4xf32>
    %c0_137 = arith.constant 0 : index
    %c19 = arith.constant 19 : index
    %c0_138 = arith.constant 0 : index
    %97 = vector.load %arg3[%c0_137, %c19, %c0_138] : memref<1x30x4xf32, #tpu.memory_space<vmem>>, vector<1x1x4xf32>
    %98 = vector.shape_cast %97 : vector<1x1x4xf32> to vector<1x4xf32>
    %99 = vector.shape_cast %96 : vector<1x4xf32> to vector<1x1x4xf32>
    tpu.vector_store %arg3[%c0_137, %c19, %c0_138], %99 {strides = array<i32>} : memref<1x30x4xf32, #tpu.memory_space<vmem>>, vector<1x1x4xf32>,
    %c0_139 = arith.constant 0 : index
    %c4_140 = arith.constant 4 : index
    %c8_141 = arith.constant 8 : index
    %c0_142 = arith.constant 0 : index
    %100 = vector.load %arg2[%c0_139, %c4_140, %c8_141, %c0_142] : memref<1x16x16x4xf32, #tpu.memory_space<vmem>>, vector<1x4x4x4xf32>
    %cst_143 = arith.constant dense<0xFF800000> : vector<1x4xf32>
    %101 = vector.multi_reduction <maximumf>, %100, %cst_143 [1, 2] : vector<1x4x4x4xf32> to vector<1x4xf32>
    %c0_144 = arith.constant 0 : index
    %c20 = arith.constant 20 : index
    %c0_145 = arith.constant 0 : index
    %102 = vector.load %arg3[%c0_144, %c20, %c0_145] : memref<1x30x4xf32, #tpu.memory_space<vmem>>, vector<1x1x4xf32>
    %103 = vector.shape_cast %102 : vector<1x1x4xf32> to vector<1x4xf32>
    %104 = vector.shape_cast %101 : vector<1x4xf32> to vector<1x1x4xf32>
    tpu.vector_store %arg3[%c0_144, %c20, %c0_145], %104 {strides = array<i32>} : memref<1x30x4xf32, #tpu.memory_space<vmem>>, vector<1x1x4xf32>,
    %c0_146 = arith.constant 0 : index
    %c4_147 = arith.constant 4 : index
    %c12_148 = arith.constant 12 : index
    %c0_149 = arith.constant 0 : index
    %105 = vector.load %arg2[%c0_146, %c4_147, %c12_148, %c0_149] : memref<1x16x16x4xf32, #tpu.memory_space<vmem>>, vector<1x4x4x4xf32>
    %cst_150 = arith.constant dense<0xFF800000> : vector<1x4xf32>
    %106 = vector.multi_reduction <maximumf>, %105, %cst_150 [1, 2] : vector<1x4x4x4xf32> to vector<1x4xf32>
    %c0_151 = arith.constant 0 : index
    %c21 = arith.constant 21 : index
    %c0_152 = arith.constant 0 : index
    %107 = vector.load %arg3[%c0_151, %c21, %c0_152] : memref<1x30x4xf32, #tpu.memory_space<vmem>>, vector<1x1x4xf32>
    %108 = vector.shape_cast %107 : vector<1x1x4xf32> to vector<1x4xf32>
    %109 = vector.shape_cast %106 : vector<1x4xf32> to vector<1x1x4xf32>
    tpu.vector_store %arg3[%c0_151, %c21, %c0_152], %109 {strides = array<i32>} : memref<1x30x4xf32, #tpu.memory_space<vmem>>, vector<1x1x4xf32>,
    %c0_153 = arith.constant 0 : index
    %c8_154 = arith.constant 8 : index
    %c0_155 = arith.constant 0 : index
    %c0_156 = arith.constant 0 : index
    %110 = vector.load %arg2[%c0_153, %c8_154, %c0_155, %c0_156] : memref<1x16x16x4xf32, #tpu.memory_space<vmem>>, vector<1x4x4x4xf32>
    %cst_157 = arith.constant dense<0xFF800000> : vector<1x4xf32>
    %111 = vector.multi_reduction <maximumf>, %110, %cst_157 [1, 2] : vector<1x4x4x4xf32> to vector<1x4xf32>
    %c0_158 = arith.constant 0 : index
    %c22 = arith.constant 22 : index
    %c0_159 = arith.constant 0 : index
    %112 = vector.load %arg3[%c0_158, %c22, %c0_159] : memref<1x30x4xf32, #tpu.memory_space<vmem>>, vector<1x1x4xf32>
    %113 = vector.shape_cast %112 : vector<1x1x4xf32> to vector<1x4xf32>
    %114 = vector.shape_cast %111 : vector<1x4xf32> to vector<1x1x4xf32>
    tpu.vector_store %arg3[%c0_158, %c22, %c0_159], %114 {strides = array<i32>} : memref<1x30x4xf32, #tpu.memory_space<vmem>>, vector<1x1x4xf32>,
    %c0_160 = arith.constant 0 : index
    %c8_161 = arith.constant 8 : index
    %c4_162 = arith.constant 4 : index
    %c0_163 = arith.constant 0 : index
    %115 = vector.load %arg2[%c0_160, %c8_161, %c4_162, %c0_163] : memref<1x16x16x4xf32, #tpu.memory_space<vmem>>, vector<1x4x4x4xf32>
    %cst_164 = arith.constant dense<0xFF800000> : vector<1x4xf32>
    %116 = vector.multi_reduction <maximumf>, %115, %cst_164 [1, 2] : vector<1x4x4x4xf32> to vector<1x4xf32>
    %c0_165 = arith.constant 0 : index
    %c23 = arith.constant 23 : index
    %c0_166 = arith.constant 0 : index
    %117 = vector.load %arg3[%c0_165, %c23, %c0_166] : memref<1x30x4xf32, #tpu.memory_space<vmem>>, vector<1x1x4xf32>
    %118 = vector.shape_cast %117 : vector<1x1x4xf32> to vector<1x4xf32>
    %119 = vector.shape_cast %116 : vector<1x4xf32> to vector<1x1x4xf32>
    tpu.vector_store %arg3[%c0_165, %c23, %c0_166], %119 {strides = array<i32>} : memref<1x30x4xf32, #tpu.memory_space<vmem>>, vector<1x1x4xf32>,
    %c0_167 = arith.constant 0 : index
    %c8_168 = arith.constant 8 : index
    %c8_169 = arith.constant 8 : index
    %c0_170 = arith.constant 0 : index
    %120 = vector.load %arg2[%c0_167, %c8_168, %c8_169, %c0_170] : memref<1x16x16x4xf32, #tpu.memory_space<vmem>>, vector<1x4x4x4xf32>
    %cst_171 = arith.constant dense<0xFF800000> : vector<1x4xf32>
    %121 = vector.multi_reduction <maximumf>, %120, %cst_171 [1, 2] : vector<1x4x4x4xf32> to vector<1x4xf32>
    %c0_172 = arith.constant 0 : index
    %c24 = arith.constant 24 : index
    %c0_173 = arith.constant 0 : index
    %122 = vector.load %arg3[%c0_172, %c24, %c0_173] : memref<1x30x4xf32, #tpu.memory_space<vmem>>, vector<1x1x4xf32>
    %123 = vector.shape_cast %122 : vector<1x1x4xf32> to vector<1x4xf32>
    %124 = vector.shape_cast %121 : vector<1x4xf32> to vector<1x1x4xf32>
    tpu.vector_store %arg3[%c0_172, %c24, %c0_173], %124 {strides = array<i32>} : memref<1x30x4xf32, #tpu.memory_space<vmem>>, vector<1x1x4xf32>,
    %c0_174 = arith.constant 0 : index
    %c8_175 = arith.constant 8 : index
    %c12_176 = arith.constant 12 : index
    %c0_177 = arith.constant 0 : index
    %125 = vector.load %arg2[%c0_174, %c8_175, %c12_176, %c0_177] : memref<1x16x16x4xf32, #tpu.memory_space<vmem>>, vector<1x4x4x4xf32>
    %cst_178 = arith.constant dense<0xFF800000> : vector<1x4xf32>
    %126 = vector.multi_reduction <maximumf>, %125, %cst_178 [1, 2] : vector<1x4x4x4xf32> to vector<1x4xf32>
    %c0_179 = arith.constant 0 : index
    %c25 = arith.constant 25 : index
    %c0_180 = arith.constant 0 : index
    %127 = vector.load %arg3[%c0_179, %c25, %c0_180] : memref<1x30x4xf32, #tpu.memory_space<vmem>>, vector<1x1x4xf32>
    %128 = vector.shape_cast %127 : vector<1x1x4xf32> to vector<1x4xf32>
    %129 = vector.shape_cast %126 : vector<1x4xf32> to vector<1x1x4xf32>
    tpu.vector_store %arg3[%c0_179, %c25, %c0_180], %129 {strides = array<i32>} : memref<1x30x4xf32, #tpu.memory_space<vmem>>, vector<1x1x4xf32>,
    %c0_181 = arith.constant 0 : index
    %c12_182 = arith.constant 12 : index
    %c0_183 = arith.constant 0 : index
    %c0_184 = arith.constant 0 : index
    %130 = vector.load %arg2[%c0_181, %c12_182, %c0_183, %c0_184] : memref<1x16x16x4xf32, #tpu.memory_space<vmem>>, vector<1x4x4x4xf32>
    %cst_185 = arith.constant dense<0xFF800000> : vector<1x4xf32>
    %131 = vector.multi_reduction <maximumf>, %130, %cst_185 [1, 2] : vector<1x4x4x4xf32> to vector<1x4xf32>
    %c0_186 = arith.constant 0 : index
    %c26 = arith.constant 26 : index
    %c0_187 = arith.constant 0 : index
    %132 = vector.load %arg3[%c0_186, %c26, %c0_187] : memref<1x30x4xf32, #tpu.memory_space<vmem>>, vector<1x1x4xf32>
    %133 = vector.shape_cast %132 : vector<1x1x4xf32> to vector<1x4xf32>
    %134 = vector.shape_cast %131 : vector<1x4xf32> to vector<1x1x4xf32>
    tpu.vector_store %arg3[%c0_186, %c26, %c0_187], %134 {strides = array<i32>} : memref<1x30x4xf32, #tpu.memory_space<vmem>>, vector<1x1x4xf32>,
    %c0_188 = arith.constant 0 : index
    %c12_189 = arith.constant 12 : index
    %c4_190 = arith.constant 4 : index
    %c0_191 = arith.constant 0 : index
    %135 = vector.load %arg2[%c0_188, %c12_189, %c4_190, %c0_191] : memref<1x16x16x4xf32, #tpu.memory_space<vmem>>, vector<1x4x4x4xf32>
    %cst_192 = arith.constant dense<0xFF800000> : vector<1x4xf32>
    %136 = vector.multi_reduction <maximumf>, %135, %cst_192 [1, 2] : vector<1x4x4x4xf32> to vector<1x4xf32>
    %c0_193 = arith.constant 0 : index
    %c27 = arith.constant 27 : index
    %c0_194 = arith.constant 0 : index
    %137 = vector.load %arg3[%c0_193, %c27, %c0_194] : memref<1x30x4xf32, #tpu.memory_space<vmem>>, vector<1x1x4xf32>
    %138 = vector.shape_cast %137 : vector<1x1x4xf32> to vector<1x4xf32>
    %139 = vector.shape_cast %136 : vector<1x4xf32> to vector<1x1x4xf32>
    tpu.vector_store %arg3[%c0_193, %c27, %c0_194], %139 {strides = array<i32>} : memref<1x30x4xf32, #tpu.memory_space<vmem>>, vector<1x1x4xf32>,
    %c0_195 = arith.constant 0 : index
    %c12_196 = arith.constant 12 : index
    %c8_197 = arith.constant 8 : index
    %c0_198 = arith.constant 0 : index
    %140 = vector.load %arg2[%c0_195, %c12_196, %c8_197, %c0_198] : memref<1x16x16x4xf32, #tpu.memory_space<vmem>>, vector<1x4x4x4xf32>
    %cst_199 = arith.constant dense<0xFF800000> : vector<1x4xf32>
    %141 = vector.multi_reduction <maximumf>, %140, %cst_199 [1, 2] : vector<1x4x4x4xf32> to vector<1x4xf32>
    %c0_200 = arith.constant 0 : index
    %c28 = arith.constant 28 : index
    %c0_201 = arith.constant 0 : index
    %142 = vector.load %arg3[%c0_200, %c28, %c0_201] : memref<1x30x4xf32, #tpu.memory_space<vmem>>, vector<1x1x4xf32>
    %143 = vector.shape_cast %142 : vector<1x1x4xf32> to vector<1x4xf32>
    %144 = vector.shape_cast %141 : vector<1x4xf32> to vector<1x1x4xf32>
    tpu.vector_store %arg3[%c0_200, %c28, %c0_201], %144 {strides = array<i32>} : memref<1x30x4xf32, #tpu.memory_space<vmem>>, vector<1x1x4xf32>,
    %c0_202 = arith.constant 0 : index
    %c12_203 = arith.constant 12 : index
    %c12_204 = arith.constant 12 : index
    %c0_205 = arith.constant 0 : index
    %145 = vector.load %arg2[%c0_202, %c12_203, %c12_204, %c0_205] : memref<1x16x16x4xf32, #tpu.memory_space<vmem>>, vector<1x4x4x4xf32>
    %cst_206 = arith.constant dense<0xFF800000> : vector<1x4xf32>
    %146 = vector.multi_reduction <maximumf>, %145, %cst_206 [1, 2] : vector<1x4x4x4xf32> to vector<1x4xf32>
    %c0_207 = arith.constant 0 : index
    %c29 = arith.constant 29 : index
    %c0_208 = arith.constant 0 : index
    %147 = vector.load %arg3[%c0_207, %c29, %c0_208] : memref<1x30x4xf32, #tpu.memory_space<vmem>>, vector<1x1x4xf32>
    %148 = vector.shape_cast %147 : vector<1x1x4xf32> to vector<1x4xf32>
    %149 = vector.shape_cast %146 : vector<1x4xf32> to vector<1x1x4xf32>
    tpu.vector_store %arg3[%c0_207, %c29, %c0_208], %149 {strides = array<i32>} : memref<1x30x4xf32, #tpu.memory_space<vmem>>, vector<1x1x4xf32>,
    return
  }
  func.func @transform_0(%arg0: i32, %arg1: i32) -> (i32, i32, i32, i32) {
    %c0_i32 = arith.constant 0 : i32
    %c0_i32_0 = arith.constant 0 : i32
    %c0_i32_1 = arith.constant 0 : i32
    return %arg0, %c0_i32, %c0_i32_0, %arg1 : i32, i32, i32, i32
  }
  func.func @transform_1(%arg0: i32, %arg1: i32) -> (i32, i32, i32) {
    %c0_i32 = arith.constant 0 : i32
    %c0_i32_0 = arith.constant 0 : i32
    return %arg0, %c0_i32, %arg1 : i32, i32, i32
  }
}

</mosaic_0001>

<bundles_post_ra>
// kernel: tpu_custom_call.1
= control target key start
LH: loop header
LB: loop body
LE: loop exit
PB: predicated region body
PF: predicated region fallthrough
CT: control target
= control target key end

     0   :  { %s1137_s6 = smov 0   ;;  %s1139_s7 = smov 0   ;;  %s1618_s0 = inlined_call_operand.vmem [shape: f32[2,16,16,4], index: 0, kind: input, shape index: {}]   ;;  %s1619_s1 = inlined_call_operand.vmem [shape: f32[2,30,4], index: 1, kind: output, shape index: {}]  }
   0x1   :  { %s1141_s8 = smov 0  }
   0x2 LB: > { %s23_s9 = sadd.s32 1, %s1121_s7  ;;  %p970_p0 = scmp.ge.s32.totalorder %s1125_s8, 1  ;;  %s1125_s8 = sphi %s1141_s8, %s11_s8   ;;  %s1121_s7 = sphi %s1139_s7, %s1621_s7   ;;  %s1117_s6 = sphi %s1137_s6, %s1620_s6  }
   0x3   : > { %p25_p1 = scmp.ge.s32.totalorder %s23_s9, 2  ;;  %p106_p2 = scmp.lt.s32.totalorder %s1125_s8, 3 }
   0x5   : > { %s1623_s9 = smov (%p25_p1, %s23_s9), 0  ;;  %p107_p3 = pnand %p970_p0, %p106_p2 }
   0x6   : > { %p132_p4 = scmp.lt.s32.totalorder (!%p107_p3), %s1117_s6, 1  ;;  %vm180_vm0 = vcmask (!%p107_p3), 31744   ;;  %vm379_vm1 = vcmask (!%p107_p3), 29696   ;;  %vm250_vm2 = vcmask (!%p107_p3), 24576   ;;  %vm596_vm3 = vcmask (!%p107_p3), 27648  }
   0x7   : > { %110 = sbr.rel (%p107_p3) target bundleno = 150 (0x96), region = 24 }
   0xe   : > { %s1625_s6 = smov (!%p132_p4, %s1117_s6), 1 }
   0xf   : > { %s1077_s10 = sshll.u32 %s1625_s6, 8  ;;  %s1078_s14 = sshll.u32 %s1625_s6, 5 }
  0x10   : > { %s1161_s13 = scalar_lea.vmem %s1618_s0, %s1077_s10  ;;  %s1329_s17 = scalar_lea.vmem %s1619_s1, %s1078_s14 }
  0x11   : > { %v148_v0 = vld [vmem:[%s1161_s13] sm:$0xff]  ;;  %v149_v1 = vld [vmem:[%s1161_s13 + $0x8] sm:$0xff]  ;;  %v150_v2 = vld [vmem:[%s1161_s13 + $0x10] sm:$0xff] }
  0x12   : > { %v151_v3 = vld [vmem:[%s1161_s13 + $0x18] sm:$0xff]  ;;  %v152_v4 = vld [vmem:[%s1161_s13 + $0x20] sm:$0xff]  ;;  %v153_v5 = vld [vmem:[%s1161_s13 + $0x28] sm:$0xff]  ;;  %v1170_v6 = vsel %vm180_vm0, %v148_v0, -inf  ;;  %v1173_v7 = vsel %vm180_vm0, %v149_v1, -inf  ;;  %v1176_v8 = vsel %vm180_vm0, %v150_v2, -inf }
  0x13   : > { %v154_v9 = vld [vmem:[%s1161_s13 + $0x30] sm:$0xff]  ;;  %v155_v10 = vld [vmem:[%s1161_s13 + $0x38] sm:$0xff]  ;;  %v156_v11 = vld [vmem:[%s1161_s13 + $0x40] sm:$0xff]  ;;  %v1182_v12 = vsel %vm180_vm0, %v151_v3, -inf  ;;  %v1185_v13 = vsel %vm180_vm0, %v152_v4, -inf  ;;  %v1188_v14 = vsel %vm180_vm0, %v153_v5, -inf }
  0x14   : > { %v157_v15 = vld [vmem:[%s1161_s13 + $0x48] sm:$0xff]  ;;  %v158_v16 = vld [vmem:[%s1161_s13 + $0x50] sm:$0xff]  ;;  %v159_v17 = vld [vmem:[%s1161_s13 + $0x58] sm:$0xff]  ;;  %v186_v18 = vmax.f32 %v1170_v6, %v1185_v13  ;;  %v188_v19 = vmax.f32 %v1173_v7, %v1188_v14  ;;  %v1198_v20 = vsel %vm180_vm0, %v154_v9, -inf  ;;  %v1201_v21 = vsel %vm180_vm0, %v155_v10, -inf }
  0x15   : > { %v160_v22 = vld [vmem:[%s1161_s13 + $0x60] sm:$0xff]  ;;  %v161_v23 = vld [vmem:[%s1161_s13 + $0x68] sm:$0xff]  ;;  %v162_v24 = vld [vmem:[%s1161_s13 + $0x70] sm:$0xff]  ;;  %v190_v25 = vmax.f32 %v1176_v8, %v1198_v20  ;;  %v192_v26 = vmax.f32 %v1182_v12, %v1201_v21  ;;  %v1211_v27 = vsel %vm180_vm0, %v156_v11, -inf  ;;  %v1214_v28 = vsel %vm180_vm0, %v157_v15, -inf }
  0x16   : > { %v163_v29 = vld [vmem:[%s1161_s13 + $0x78] sm:$0xff]  ;;  %v164_v30 = vld [vmem:[%s1161_s13 + $0x80] sm:$0xff]  ;;  %v165_v31 = vld [vmem:[%s1161_s13 + $0x88] sm:$0xff]  ;;  %v194_v32 = vmax.f32 %v186_v18, %v1211_v27  ;;  %v196_v33 = vmax.f32 %v188_v19, %v1214_v28  ;;  %v1222_v34 = vsel %vm180_vm0, %v158_v16, -inf  ;;  %v1225_v35 = vsel %vm180_vm0, %v159_v17, -inf }
  0x17   : > { %v166_v36 = vld [vmem:[%s1161_s13 + $0x90] sm:$0xff]  ;;  %v167_v37 = vld [vmem:[%s1161_s13 + $0x98] sm:$0xff]  ;;  %v198_v38 = vmax.f32 %v190_v25, %v1222_v34  ;;  %v200_v39 = vmax.f32 %v192_v26, %v1225_v35  ;;  %v1232_v40 = vsel %vm180_vm0, %v160_v22, -inf  ;;  %v1235_v41 = vsel %vm180_vm0, %v161_v23, -inf  ;;  %v168_v42 = vld [vmem:[%s1161_s13 + $0xa0] sm:$0xff] }
  0x18   : > { %v169_v43 = vld [vmem:[%s1161_s13 + $0xa8] sm:$0xff]  ;;  %v202_v44 = vmax.f32 %v194_v32, %v1232_v40  ;;  %v204_v45 = vmax.f32 %v196_v33, %v1235_v41  ;;  %v205_v46 = vsel %vm180_vm0, %v162_v24, -inf  ;;  %v1243_v47 = vsel %vm180_vm0, %v163_v29, -inf  ;;  %v170_v48 = vld [vmem:[%s1161_s13 + $0xb0] sm:$0xff]  ;;  %v171_v49 = vld [vmem:[%s1161_s13 + $0xb8] sm:$0xff] }
  0x19   : > { %v206_v50 = vmax.f32 %v198_v38, %v205_v46  ;;  %v208_v51 = vmax.f32 %v200_v39, %v1243_v47  ;;  %v1249_v52 = vsel %vm180_vm0, %v164_v30, -inf  ;;  %v1252_v53 = vsel %vm180_vm0, %v165_v31, -inf  ;;  %v172_v54 = vld [vmem:[%s1161_s13 + $0xc0] sm:$0xff]  ;;  %v173_v55 = vld [vmem:[%s1161_s13 + $0xc8] sm:$0xff]  ;;  %v174_v60 = vld [vmem:[%s1161_s13 + $0xd0] sm:$0xff] }
  0x1a   : > { %v210_v56 = vmax.f32 %v202_v44, %v1249_v52  ;;  %v212_v57 = vmax.f32 %v204_v45, %v1252_v53  ;;  %v213_v58 = vsel %vm180_vm0, %v166_v36, -inf  ;;  %v1260_v59 = vsel %vm180_vm0, %v167_v37, -inf  ;;  %v175_v61 = vld [vmem:[%s1161_s13 + $0xd8] sm:$0xff]  ;;  %v176_v2 = vld [vmem:[%s1161_s13 + $0xe0] sm:$0xff]  ;;  %v177_v3 = vld [vmem:[%s1161_s13 + $0xe8] sm:$0xff] }
  0x1b   : > { %v214_v62 = vmax.f32 %v206_v50, %v213_v58  ;;  %v216_v63 = vmax.f32 %v208_v51, %v1260_v59  ;;  %v217_v0 = vsel %vm180_vm0, %v168_v42, -inf  ;;  %v1267_v1 = vsel %vm180_vm0, %v169_v43, -inf  ;;  %v178_v11 = vld [vmem:[%s1161_s13 + $0xf0] sm:$0xff]  ;;  %v179_v15 = vld [vmem:[%s1161_s13 + $0xf8] sm:$0xff] }
  0x1c   : > { %v218_v4 = vmax.f32 %v210_v56, %v217_v0  ;;  %v220_v5 = vmax.f32 %v212_v57, %v1267_v1  ;;  %v221_v9 = vsel %vm180_vm0, %v170_v48, -inf  ;;  %v1274_v10 = vsel %vm180_vm0, %v171_v49, -inf }
  0x1d   : > { %v222_v16 = vmax.f32 %v214_v62, %v221_v9  ;;  %v224_v17 = vmax.f32 %v216_v63, %v1274_v10  ;;  %v225_v18 = vsel %vm180_vm0, %v172_v54, -inf  ;;  %v227_v19 = vsel %vm180_vm0, %v173_v55, -inf  ;;  %v376_v62 = vld [vmem:[%s1161_s13 + $0x30] sm:$0x3f]  ;;  %v377_v63 = vld [vmem:[%s1161_s13 + $0x40] sm:$0x3f] }
  0x1e   : > { %v226_v22 = vmax.f32 %v218_v4, %v225_v18  ;;  %v228_v23 = vmax.f32 %v220_v5, %v227_v19  ;;  %v229_v24 = vsel %vm180_vm0, %v174_v60, -inf  ;;  %v231_v25 = vsel %vm180_vm0, %v175_v61, -inf }
  0x1f   : > { %v230_v26 = vmax.f32 %v222_v16, %v229_v24  ;;  %v232_v29 = vmax.f32 %v224_v17, %v231_v25  ;;  %v233_v30 = vsel %vm180_vm0, %v176_v2, -inf  ;;  %v235_v31 = vsel %vm180_vm0, %v177_v3, -inf }
  0x20   : > { %v234_v32 = vmax.f32 %v226_v22, %v233_v30  ;;  %v236_v33 = vmax.f32 %v228_v23, %v235_v31  ;;  %v237_v36 = vsel %vm180_vm0, %v178_v11, -inf  ;;  %v239_v37 = vsel %vm180_vm0, %v179_v15, -inf }
  0x21   : > { %v238_v38 = vmax.f32 %v230_v26, %v237_v36  ;;  %v240_v39 = vmax.f32 %v232_v29, %v239_v37  ;;  %v265_v42 = vmax.f32 %v1170_v6, %v1211_v27  ;;  %v267_v43 = vmax.f32 %v1176_v8, %v1222_v34 }
  0x22   : > { %v241_v44 = vmax.f32 %v234_v32, %v236_v33  ;;  %v269_v45 = vmax.f32 %v1185_v13, %v1232_v40  ;;  %v271_v48 = vmax.f32 %v1198_v20, %v205_v46  ;;  %v295_v49 = vmax.f32 %v1173_v7, %v1214_v28  ;;  %v373_v46 = vld [vmem:[%s1161_s13] sm:$0x3f] }
  0x23   : > { %v242_v50 = vmax.f32 %v238_v38, %v240_v39  ;;  %v272_v51 = vmax.f32 %v265_v42, %v267_v43  ;;  %v297_v54 = vmax.f32 %v1182_v12, %v1225_v35  ;;  %v299_v6 = vmax.f32 %v1188_v14, %v1235_v41  ;;  %v374_v41 = vld [vmem:[%s1161_s13 + $0x10] sm:$0x3f]  ;;  %v400_v38 = vld [vmem:[%s1161_s13 + $0x25] sm:$0x3f] }
  0x24   : > { %v273_v8 = vmax.f32 %v269_v45, %v271_v48  ;;  %v301_v27 = vmax.f32 %v1201_v21, %v1243_v47  ;;  %v326_v13 = vmax.f32 %v1249_v52, %v225_v18  ;;  %v328_v20 = vmax.f32 %v213_v58, %v229_v24  ;;  %v375_v52 = vld [vmem:[%s1161_s13 + $0x20] sm:$0x3f]  ;;  %v401_v39 = vld [vmem:[%s1161_s13 + $0x35] sm:$0x3f] }
  0x25   : > { %v243_v34 = vmax.f32 %v241_v44, %v242_v50  ;;  %v302_v40 = vmax.f32 %v295_v49, %v297_v54  ;;  %v330_v7 = vmax.f32 %v217_v0, %v233_v30  ;;  %v332_v28 = vmax.f32 %v221_v9, %v237_v36  ;;  %v378_v9 = vld [vmem:[%s1161_s13 + $0x50] sm:$0x3f]  ;;  %v398_v24 = vld [vmem:[%s1161_s13 + $0x5] sm:$0x3f] }
  0x26   : > { %v274_v55 = vmax.f32 %v272_v51, %v273_v8  ;;  %v303_v12 = vmax.f32 %v299_v6, %v301_v27  ;;  %v333_v35 = vmax.f32 %v326_v13, %v328_v20  ;;  %v356_v14 = vmax.f32 %v1252_v53, %v227_v19  ;;  %v402_v54 = vld [vmem:[%s1161_s13 + $0x45] sm:$0x3f]  ;;  %v403_v6 = vld [vmem:[%s1161_s13 + $0x55] sm:$0x3f] }
  0x27   : > { %v244_v56 = vrot.slane %v243_v34, 4  ;;  %v334_v57 = vmax.f32 %v330_v7, %v332_v28  ;;  %v358_v21 = vmax.f32 %v1260_v59, %v231_v25  ;;  %v360_v47 = vmax.f32 %v1267_v1, %v235_v31  ;;  %v399_v25 = vld [vmem:[%s1161_s13 + $0x15] sm:$0x3f] }
  0x28   : > { %v275_v58 = vrot.slane %v274_v55, 4  ;;  %v304_v60 = vmax.f32 %v302_v40, %v303_v12  ;;  %v362_v61 = vmax.f32 %v1274_v10, %v239_v37  ;;  %v380_v0 = vsel %vm379_vm1, %v373_v46, -inf  ;;  %v424_v12 = vld [vmem:[%s1161_s13 + $0x2a] sm:$0x3f] }
  0x29   : > { %v245_v2 = vmax.f32 %v243_v34, %v244_v56  ;;  %v335_v53 = vmax.f32 %v333_v35, %v334_v57  ;;  %v363_v3 = vmax.f32 %v356_v14, %v358_v21  ;;  %v381_v59 = vsel %vm379_vm1, %v374_v41, -inf  ;;  %v422_v34 = vld [vmem:[%s1161_s13 + $0xa] sm:$0x3f]  ;;  %v425_v57 = vld [vmem:[%s1161_s13 + $0x3a] sm:$0x3f] }
  0x2a   : > { %v276_v1 = vmax.f32 %v274_v55, %v275_v58  ;;  %v305_v4 = vrot.slane %v304_v60, 4  ;;  %v364_v5 = vmax.f32 %v360_v47, %v362_v61  ;;  %v382_v11 = vsel %vm379_vm1, %v375_v52, -inf  ;;  %v423_v55 = vld [vmem:[%s1161_s13 + $0x1a] sm:$0x3f] }
  0x2b   : > { %v246_v15 = vrot.slane %v245_v2, 2  ;;  %v336_v10 = vrot.slane %v335_v53, 4  ;;  %v383_v16 = vsel %vm379_vm1, %v376_v62, -inf  ;;  %v384_v17 = vsel %vm379_vm1, %v377_v63, -inf  ;;  %v427_v61 = vld [vmem:[%s1161_s13 + $0x5a] sm:$0x3f] }
  0x2c   : > { %v277_v18 = vrot.slane %v276_v1, 2  ;;  %v306_v19 = vmax.f32 %v304_v60, %v305_v4  ;;  %v365_v22 = vmax.f32 %v363_v3, %v364_v5  ;;  %v385_v23 = vmax.f32 %v380_v0, %v384_v17  ;;  %v426_v60 = vld [vmem:[%s1161_s13 + $0x4a] sm:$0x3f]  ;;  %v992_v3 = vld [vmem:[%s1161_s13 + $0x60] sm:$0x3f] }
  0x2d   : > { %v247_v26 = vmax.f32 %v245_v2, %v246_v15  ;;  %v337_v29 = vmax.f32 %v335_v53, %v336_v10  ;;  %v386_v30 = vsel %vm379_vm1, %v378_v9, -inf  ;;  %v389_v31 = vmax.f32 %v382_v11, %v383_v16  ;;  %v991_v53 = vld [vmem:[%s1161_s13 + $0x50] sm:$0x3f]  ;;  %v994_v17 = vld [vmem:[%s1161_s13 + $0x80] sm:$0x3f] }
  0x2e   : > { %v278_v32 = vmax.f32 %v276_v1, %v277_v18  ;;  %v307_v33 = vrot.slane %v306_v19, 2  ;;  %v366_v36 = vrot.slane %v365_v22, 4  ;;  %v387_v37 = vmax.f32 %v381_v59, %v386_v30  ;;  %v993_v9 = vld [vmem:[%s1161_s13 + $0x70] sm:$0x3f] }
  0x2f   : > { %v248_v42 = vrot.slane %v247_v26, 1  ;;  %v338_v43 = vrot.slane %v337_v29, 2  ;;  %v404_v44 = vsel %vm379_vm1, %v398_v24, -inf  ;;  %v405_v45 = vsel %vm379_vm1, %v399_v25, -inf  ;;  %v995_v18 = vld [vmem:[%s1161_s13 + $0x90] sm:$0x3f] }
  0x30   : > { %v279_v48 = vrot.slane %v278_v32, 1  ;;  %v308_v49 = vmax.f32 %v306_v19, %v307_v33  ;;  %v367_v50 = vmax.f32 %v365_v22, %v366_v36  ;;  %v388_v51 = vmax.f32 %v385_v23, %v387_v37  ;;  %v996_v25 = vld [vmem:[%s1161_s13 + $0xa0] sm:$0x3f] }
  0x31   : > { %v249_v8 = vmax.f32 %v247_v26, %v248_v42  ;;  %v339_v27 = vmax.f32 %v337_v29, %v338_v43  ;;  %v406_v13 = vsel %vm379_vm1, %v400_v38, -inf  ;;  %v407_v20 = vsel %vm379_vm1, %v401_v39, -inf  ;;  %v997_v26 = vld [vmem:[%s1161_s13 + $0x55] sm:$0x3f]  ;;  %v998_v33 = vld [vmem:[%s1161_s13 + $0x65] sm:$0x3f] }
  0x32   : > { %v280_v40 = vmax.f32 %v278_v32, %v279_v48  ;;  %v309_v7 = vrot.slane %v308_v49, 1  ;;  %v368_v28 = vrot.slane %v367_v50, 2  ;;  %v390_v46 = vmax.f32 %v388_v51, %v389_v31  ;;  %v999_v42 = vld [vmem:[%s1161_s13 + $0x75] sm:$0x3f]  ;;  %v1000_v43 = vld [vmem:[%s1161_s13 + $0x85] sm:$0x3f] }
  0x33   : > { %251 = vst.msk [vmem:[%s1329_s17] sm:$0x1] %vm250_vm2, %v249_v8  ;;  %v340_v35 = vrot.slane %v339_v27, 1  ;;  %v408_v14 = vsel %vm379_vm1, %v402_v54, -inf  ;;  %v410_v41 = vsel %vm379_vm1, %v403_v6, -inf  ;;  %v413_v56 = vmax.f32 %v406_v13, %v407_v20 }
  0x34   : > { %281 = vst.msk [vmem:[%s1329_s17 + $0x1] sm:$0x1] %vm250_vm2, %v280_v40  ;;  %v310_v21 = vmax.f32 %v308_v49, %v309_v7  ;;  %v369_v47 = vmax.f32 %v367_v50, %v368_v28  ;;  %v391_v52 = vrot.slane %v390_v46, 4  ;;  %v409_v58 = vmax.f32 %v404_v44, %v408_v14  ;;  %v1001_v50 = vld [vmem:[%s1161_s13 + $0x95] sm:$0x3f] }
  0x35   : > { %v341_v62 = vmax.f32 %v339_v27, %v340_v35  ;;  %v411_v63 = vmax.f32 %v405_v45, %v410_v41  ;;  %v428_v0 = vsel %vm379_vm1, %v422_v34, -inf  ;;  %v429_v2 = vsel %vm379_vm1, %v423_v55, -inf  ;;  %v1002_v8 = vld [vmem:[%s1161_s13 + $0xa5] sm:$0x3f]  ;;  %v1003_v13 = vld [vmem:[%s1161_s13 + $0x5a] sm:$0x3f] }
  0x36   : > { %311 = vst.msk [vmem:[%s1329_s17 + $0x2] sm:$0x1] %vm250_vm2, %v310_v21  ;;  %v370_v59 = vrot.slane %v369_v47, 1  ;;  %v392_v1 = vmax.f32 %v390_v46, %v391_v52  ;;  %v430_v4 = vsel %vm379_vm1, %v424_v12, -inf  ;;  %v431_v5 = vsel %vm379_vm1, %v425_v57, -inf }
  0x37   : > { %342 = vst.msk [vmem:[%s1329_s17 + $0x3] sm:$0x1] %vm250_vm2, %v341_v62  ;;  %v412_v11 = vmax.f32 %v409_v58, %v411_v63  ;;  %v432_v15 = vsel %vm379_vm1, %v426_v60, -inf  ;;  %v434_v10 = vsel %vm379_vm1, %v427_v61, -inf  ;;  %v437_v16 = vmax.f32 %v430_v4, %v431_v5  ;;  %v1004_v28 = vld [vmem:[%s1161_s13 + $0x6a] sm:$0x3f] }
  0x38   : > { %v371_v19 = vmax.f32 %v369_v47, %v370_v59  ;;  %v393_v22 = vrot.slane %v392_v1, 2  ;;  %v433_v23 = vmax.f32 %v428_v0, %v432_v15  ;;  %v435_v24 = vmax.f32 %v429_v2, %v434_v10  ;;  %v1005_v14 = vld [vmem:[%s1161_s13 + $0x7a] sm:$0x3f]  ;;  %v1006_v41 = vld [vmem:[%s1161_s13 + $0x8a] sm:$0x3f] }
  0x39   : > { %v414_v29 = vmax.f32 %v412_v11, %v413_v56  ;;  %v453_v30 = vsel %vm379_vm1, %v991_v53, -inf  ;;  %v454_v31 = vsel %vm379_vm1, %v992_v3, -inf  ;;  %v455_v32 = vsel %vm379_vm1, %v993_v9, -inf  ;;  %v1007_v52 = vld [vmem:[%s1161_s13 + $0x9a] sm:$0x3f] }
  0x3a   : > { %372 = vst.msk [vmem:[%s1329_s17 + $0x4] sm:$0x1] %vm250_vm2, %v371_v19  ;;  %v394_v36 = vmax.f32 %v392_v1, %v393_v22  ;;  %v436_v37 = vmax.f32 %v433_v23, %v435_v24  ;;  %v456_v38 = vsel %vm379_vm1, %v994_v17, -inf  ;;  %v457_v39 = vsel %vm379_vm1, %v995_v18, -inf  ;;  %v1008_v62 = vld [vmem:[%s1161_s13 + $0xaa] sm:$0x3f] }
  0x3b   : > { %v415_v44 = vrot.slane %v414_v29, 4  ;;  %v458_v45 = vmax.f32 %v453_v30, %v457_v39  ;;  %v459_v48 = vsel %vm379_vm1, %v996_v25, -inf  ;;  %v462_v49 = vmax.f32 %v455_v32, %v456_v38  ;;  %v1009_v0 = vld [vmem:[%s1161_s13 + $0xa0] sm:$0x3f]  ;;  %v1010_v1 = vld [vmem:[%s1161_s13 + $0xb0] sm:$0x3f] }
  0x3c   : > { %v395_v51 = vrot.slane %v394_v36, 1  ;;  %v438_v54 = vmax.f32 %v436_v37, %v437_v16  ;;  %v460_v6 = vmax.f32 %v454_v31, %v459_v48  ;;  %v477_v27 = vsel %vm379_vm1, %v997_v26, -inf  ;;  %v1011_v15 = vld [vmem:[%s1161_s13 + $0xc0] sm:$0x3f]  ;;  %v1012_v19 = vld [vmem:[%s1161_s13 + $0xd0] sm:$0x3f] }
  0x3d   : > { %v416_v20 = vmax.f32 %v414_v29, %v415_v44  ;;  %v478_v34 = vsel %vm379_vm1, %v998_v33, -inf  ;;  %v479_v40 = vsel %vm379_vm1, %v999_v42, -inf  ;;  %v480_v7 = vsel %vm379_vm1, %v1000_v43, -inf  ;;  %v1013_v26 = vld [vmem:[%s1161_s13 + $0xe0] sm:$0x3f] }
  0x3e   : > { %v396_v46 = vmax.f32 %v394_v36, %v395_v51  ;;  %v439_v55 = vrot.slane %v438_v54, 4  ;;  %v461_v12 = vmax.f32 %v458_v45, %v460_v6  ;;  %v481_v35 = vsel %vm379_vm1, %v1001_v50, -inf  ;;  %v1014_v29 = vld [vmem:[%s1161_s13 + $0xf0] sm:$0x3f]  ;;  %v1015_v30 = vld [vmem:[%s1161_s13 + $0xa5] sm:$0x3f] }
  0x3f   : > { %v417_v56 = vrot.slane %v416_v20, 2  ;;  %v482_v57 = vmax.f32 %v477_v27, %v481_v35  ;;  %v483_v21 = vsel %vm379_vm1, %v1002_v8, -inf  ;;  %v486_v47 = vmax.f32 %v479_v40, %v480_v7  ;;  %v1016_v43 = vld [vmem:[%s1161_s13 + $0xb5] sm:$0x3f] }
  0x40   : > { %397 = vst.msk [vmem:[%s1329_s17 + $0x5] sm:$0x1] %vm250_vm2, %v396_v46  ;;  %v440_v58 = vmax.f32 %v438_v54, %v439_v55  ;;  %v463_v60 = vmax.f32 %v461_v12, %v462_v49  ;;  %v484_v61 = vmax.f32 %v478_v34, %v483_v21  ;;  %v501_v63 = vsel %vm379_vm1, %v1003_v13, -inf  ;;  %v1017_v49 = vld [vmem:[%s1161_s13 + $0xc5] sm:$0x3f] }
  0x41   : > { %v418_v2 = vmax.f32 %v416_v20, %v417_v56  ;;  %v502_v53 = vsel %vm379_vm1, %v1004_v28, -inf  ;;  %v503_v3 = vsel %vm379_vm1, %v1005_v14, -inf  ;;  %v504_v59 = vsel %vm379_vm1, %v1006_v41, -inf  ;;  %v1018_v27 = vld [vmem:[%s1161_s13 + $0xd5] sm:$0x3f] }
  0x42   : > { %v441_v4 = vrot.slane %v440_v58, 2  ;;  %v464_v5 = vrot.slane %v463_v60, 4  ;;  %v485_v9 = vmax.f32 %v482_v57, %v484_v61  ;;  %v505_v11 = vsel %vm379_vm1, %v1007_v52, -inf  ;;  %v1019_v13 = vld [vmem:[%s1161_s13 + $0xe5] sm:$0x3f] }
  0x43   : > { %v419_v10 = vrot.slane %v418_v2, 1  ;;  %v506_v16 = vmax.f32 %v501_v63, %v505_v11  ;;  %v507_v17 = vsel %vm379_vm1, %v1008_v62, -inf  ;;  %v510_v18 = vmax.f32 %v503_v3, %v504_v59  ;;  %v1020_v20 = vld [vmem:[%s1161_s13 + $0xf5] sm:$0x3f]  ;;  %v1021_v46 = vld [vmem:[%s1161_s13 + $0xaa] sm:$0x3f] }
  0x44   : > { %v442_v22 = vmax.f32 %v440_v58, %v441_v4  ;;  %v465_v23 = vmax.f32 %v463_v60, %v464_v5  ;;  %v487_v24 = vmax.f32 %v485_v9, %v486_v47  ;;  %v508_v25 = vmax.f32 %v502_v53, %v507_v17  ;;  %v1022_v41 = vld [vmem:[%s1161_s13 + $0xba] sm:$0x3f]  ;;  %v1023_v52 = vld [vmem:[%s1161_s13 + $0xca] sm:$0x3f]  ;;  %v592_v4 = vld [vmem:[%s1161_s13] sm:$0xf] }
  0x45   : > { %v420_v31 = vmax.f32 %v418_v2, %v419_v10  ;;  %v526_v32 = vsel %vm379_vm1, %v1009_v0, -inf  ;;  %v527_v33 = vsel %vm379_vm1, %v1010_v1, -inf  ;;  %v528_v36 = vsel %vm379_vm1, %v1011_v15, -inf  ;;  %v1024_v63 = vld [vmem:[%s1161_s13 + $0xda] sm:$0x3f] }
  0x46   : > { %v443_v37 = vrot.slane %v442_v22, 1  ;;  %v466_v38 = vrot.slane %v465_v23, 2  ;;  %v488_v39 = vrot.slane %v487_v24, 4  ;;  %v509_v42 = vmax.f32 %v506_v16, %v508_v25  ;;  %v1025_v0 = vld [vmem:[%s1161_s13 + $0xea] sm:$0x3f] }
  0x47   : > { %421 = vst.msk [vmem:[%s1329_s17 + $0x6] sm:$0x1] %vm250_vm2, %v420_v31  ;;  %v529_v44 = vsel %vm379_vm1, %v1012_v19, -inf  ;;  %v530_v45 = vsel %vm379_vm1, %v1013_v26, -inf  ;;  %v532_v48 = vsel %vm379_vm1, %v1014_v29, -inf  ;;  %v550_v50 = vsel %vm379_vm1, %v1015_v30, -inf }
  0x48   : > { %v444_v51 = vmax.f32 %v442_v22, %v443_v37  ;;  %v467_v54 = vmax.f32 %v465_v23, %v466_v38  ;;  %v489_v6 = vmax.f32 %v487_v24, %v488_v39  ;;  %v511_v8 = vmax.f32 %v509_v42, %v510_v18  ;;  %v1026_v59 = vld [vmem:[%s1161_s13 + $0xfa] sm:$0x3f]  ;;  %v593_v10 = vld [vmem:[%s1161_s13 + $0x10] sm:$0xf]  ;;  %v594_v22 = vld [vmem:[%s1161_s13 + $0x20] sm:$0xf] }
  0x49   : > { %v531_v34 = vmax.f32 %v526_v32, %v530_v45  ;;  %v533_v40 = vmax.f32 %v527_v33, %v532_v48  ;;  %v535_v7 = vmax.f32 %v528_v36, %v529_v44  ;;  %v551_v28 = vsel %vm379_vm1, %v1016_v43, -inf  ;;  %v595_v29 = vld [vmem:[%s1161_s13 + $0x30] sm:$0xf]  ;;  %v611_v36 = vld [vmem:[%s1161_s13 + $0x4] sm:$0xf] }
  0x4a   : > { %445 = vst.msk [vmem:[%s1329_s17 + $0x7] sm:$0x1] %vm250_vm2, %v444_v51  ;;  %v468_v55 = vrot.slane %v467_v54, 1  ;;  %v490_v12 = vrot.slane %v489_v6, 2  ;;  %v512_v35 = vrot.slane %v511_v8, 4  ;;  %v552_v14 = vsel %vm379_vm1, %v1017_v49, -inf }
  0x4b   : > { %v534_v56 = vmax.f32 %v531_v34, %v533_v40  ;;  %v553_v57 = vsel %vm379_vm1, %v1018_v27, -inf  ;;  %v554_v21 = vsel %vm379_vm1, %v1019_v13, -inf  ;;  %v556_v47 = vsel %vm379_vm1, %v1020_v20, -inf  ;;  %v612_v37 = vld [vmem:[%s1161_s13 + $0x14] sm:$0xf] }
  0x4c   : > { %v469_v58 = vmax.f32 %v467_v54, %v468_v55  ;;  %v491_v60 = vmax.f32 %v489_v6, %v490_v12  ;;  %v513_v61 = vmax.f32 %v511_v8, %v512_v35  ;;  %v555_v62 = vmax.f32 %v550_v50, %v554_v21  ;;  %v613_v44 = vld [vmem:[%s1161_s13 + $0x24] sm:$0xf]  ;;  %v614_v51 = vld [vmem:[%s1161_s13 + $0x34] sm:$0xf]  ;;  %v629_v13 = vld [vmem:[%s1161_s13 + $0x8] sm:$0xf] }
  0x4d   : > { %v536_v2 = vmax.f32 %v534_v56, %v535_v7  ;;  %v557_v53 = vmax.f32 %v551_v28, %v556_v47  ;;  %v559_v3 = vmax.f32 %v552_v14, %v553_v57  ;;  %v574_v1 = vsel %vm379_vm1, %v1021_v46, -inf  ;;  %v630_v28 = vld [vmem:[%s1161_s13 + $0x18] sm:$0xf]  ;;  %v631_v46 = vld [vmem:[%s1161_s13 + $0x28] sm:$0xf] }
  0x4e   : > { %470 = vst.msk [vmem:[%s1329_s17 + $0x8] sm:$0x1] %vm250_vm2, %v469_v58  ;;  %v492_v5 = vrot.slane %v491_v60, 1  ;;  %v514_v9 = vrot.slane %v513_v61, 2  ;;  %v575_v11 = vsel %vm379_vm1, %v1022_v41, -inf  ;;  %v576_v15 = vsel %vm379_vm1, %v1023_v52, -inf }
  0x4f   : > { %v537_v16 = vrot.slane %v536_v2, 4  ;;  %v558_v17 = vmax.f32 %v555_v62, %v557_v53  ;;  %v577_v18 = vsel %vm379_vm1, %v1024_v63, -inf  ;;  %v578_v19 = vsel %vm379_vm1, %v1025_v0, -inf  ;;  %v632_v41 = vld [vmem:[%s1161_s13 + $0x38] sm:$0xf] }
  0x50   : > { %v493_v23 = vmax.f32 %v491_v60, %v492_v5  ;;  %v515_v24 = vmax.f32 %v513_v61, %v514_v9  ;;  %v579_v25 = vmax.f32 %v574_v1, %v578_v19  ;;  %v580_v26 = vsel %vm379_vm1, %v1026_v59, -inf  ;;  %v647_v52 = vld [vmem:[%s1161_s13 + $0xc] sm:$0xf]  ;;  %v650_v1 = vld [vmem:[%s1161_s13 + $0x3c] sm:$0xf] }
  0x51   : > { %v538_v30 = vmax.f32 %v536_v2, %v537_v16  ;;  %v560_v31 = vmax.f32 %v558_v17, %v559_v3  ;;  %v581_v32 = vmax.f32 %v575_v11, %v580_v26  ;;  %v583_v33 = vmax.f32 %v576_v15, %v577_v18  ;;  %v648_v3 = vld [vmem:[%s1161_s13 + $0x1c] sm:$0xf]  ;;  %v649_v59 = vld [vmem:[%s1161_s13 + $0x2c] sm:$0xf]  ;;  %v1027_v18 = vld [vmem:[%s1161_s13 + $0x40] sm:$0xf] }
  0x52   : > { %494 = vst.msk [vmem:[%s1329_s17 + $0x9] sm:$0x1] %vm250_vm2, %v493_v23  ;;  %v516_v38 = vrot.slane %v515_v24, 1  ;;  %v597_v39 = vsel %vm596_vm3, %v592_v4, -inf  ;;  %v598_v42 = vsel %vm596_vm3, %v593_v10, -inf  ;;  %v599_v43 = vsel %vm596_vm3, %v594_v22, -inf }
  0x53   : > { %v539_v45 = vrot.slane %v538_v30, 2  ;;  %v561_v48 = vrot.slane %v560_v31, 4  ;;  %v582_v49 = vmax.f32 %v579_v25, %v581_v32  ;;  %v600_v50 = vsel %vm596_vm3, %v595_v29, -inf  ;;  %v1028_v25 = vld [vmem:[%s1161_s13 + $0x50] sm:$0xf] }
  0x54   : > { %v517_v54 = vmax.f32 %v515_v24, %v516_v38  ;;  %v601_v6 = vmax.f32 %v597_v39, %v598_v42  ;;  %v602_v8 = vmax.f32 %v599_v43, %v600_v50  ;;  %v615_v27 = vsel %vm596_vm3, %v611_v36, -inf  ;;  %v1029_v32 = vld [vmem:[%s1161_s13 + $0x60] sm:$0xf]  ;;  %v1031_v42 = vld [vmem:[%s1161_s13 + $0x44] sm:$0xf] }
  0x55   : > { %v540_v20 = vmax.f32 %v538_v30, %v539_v45  ;;  %v562_v34 = vmax.f32 %v560_v31, %v561_v48  ;;  %v584_v40 = vmax.f32 %v582_v49, %v583_v33  ;;  %v616_v7 = vsel %vm596_vm3, %v612_v37, -inf  ;;  %v1030_v33 = vld [vmem:[%s1161_s13 + $0x70] sm:$0xf]  ;;  %v1032_v49 = vld [vmem:[%s1161_s13 + $0x54] sm:$0xf] }
  0x56   : > { %518 = vst.msk [vmem:[%s1329_s17 + $0xa] sm:$0x1] %vm250_vm2, %v517_v54  ;;  %v603_v55 = vmax.f32 %v601_v6, %v602_v8  ;;  %v617_v12 = vsel %vm596_vm3, %v613_v44, -inf  ;;  %v618_v35 = vsel %vm596_vm3, %v614_v51, -inf  ;;  %v619_v14 = vmax.f32 %v615_v27, %v616_v7  ;;  %v1033_v8 = vld [vmem:[%s1161_s13 + $0x64] sm:$0xf] }
  0x57   : > { %v541_v56 = vrot.slane %v540_v20, 1  ;;  %v563_v57 = vrot.slane %v562_v34, 2  ;;  %v585_v21 = vrot.slane %v584_v40, 4  ;;  %v620_v47 = vmax.f32 %v617_v12, %v618_v35  ;;  %v1035_v12 = vld [vmem:[%s1161_s13 + $0x48] sm:$0xf] }
  0x58   : > { %v604_v58 = vrot.slane %v603_v55, 4  ;;  %v633_v60 = vsel %vm596_vm3, %v629_v13, -inf  ;;  %v634_v61 = vsel %vm596_vm3, %v630_v28, -inf  ;;  %v635_v62 = vsel %vm596_vm3, %v631_v46, -inf  ;;  %v1036_v35 = vld [vmem:[%s1161_s13 + $0x58] sm:$0xf] }
  0x59   : > { %v542_v63 = vmax.f32 %v540_v20, %v541_v56  ;;  %v564_v0 = vmax.f32 %v562_v34, %v563_v57  ;;  %v586_v2 = vmax.f32 %v584_v40, %v585_v21  ;;  %v621_v53 = vmax.f32 %v619_v14, %v620_v47  ;;  %v1034_v40 = vld [vmem:[%s1161_s13 + $0x74] sm:$0xf]  ;;  %v1037_v21 = vld [vmem:[%s1161_s13 + $0x68] sm:$0xf] }
  0x5a   : > { %v605_v4 = vmax.f32 %v603_v55, %v604_v58  ;;  %v636_v5 = vsel %vm596_vm3, %v632_v41, -inf  ;;  %v637_v9 = vmax.f32 %v633_v60, %v634_v61  ;;  %v651_v11 = vsel %vm596_vm3, %v647_v52, -inf  ;;  %v1038_v61 = vld [vmem:[%s1161_s13 + $0x78] sm:$0xf] }
  0x5b   : > { %543 = vst.msk [vmem:[%s1329_s17 + $0xb] sm:$0x1] %vm250_vm2, %v542_v63  ;;  %v565_v15 = vrot.slane %v564_v0, 1  ;;  %v587_v10 = vrot.slane %v586_v2, 2  ;;  %v622_v16 = vrot.slane %v621_v53, 4  ;;  %v638_v17 = vmax.f32 %v635_v62, %v636_v5 }
  0x5c   : > { %v606_v19 = vrot.slane %v605_v4, 2  ;;  %v652_v22 = vsel %vm596_vm3, %v648_v3, -inf  ;;  %v653_v23 = vsel %vm596_vm3, %v649_v59, -inf  ;;  %v654_v24 = vsel %vm596_vm3, %v650_v1, -inf  ;;  %v1040_v3 = vld [vmem:[%s1161_s13 + $0x5c] sm:$0xf] }
  0x5d   : > { %v566_v26 = vmax.f32 %v564_v0, %v565_v15  ;;  %v588_v29 = vmax.f32 %v586_v2, %v587_v10  ;;  %v623_v30 = vmax.f32 %v621_v53, %v622_v16  ;;  %v639_v31 = vmax.f32 %v637_v9, %v638_v17  ;;  %v1039_v53 = vld [vmem:[%s1161_s13 + $0x4c] sm:$0xf]  ;;  %v1042_v17 = vld [vmem:[%s1161_s13 + $0x7c] sm:$0xf] }
  0x5e   : > { %v607_v36 = vmax.f32 %v605_v4, %v606_v19  ;;  %v655_v37 = vmax.f32 %v651_v11, %v652_v22  ;;  %v656_v38 = vmax.f32 %v653_v23, %v654_v24  ;;  %v670_v39 = vsel %vm596_vm3, %v1027_v18, -inf  ;;  %v1041_v9 = vld [vmem:[%s1161_s13 + $0x6c] sm:$0xf]  ;;  %v1043_v24 = vld [vmem:[%s1161_s13 + $0x80] sm:$0xf] }
  0x5f   : > { %567 = vst.msk [vmem:[%s1329_s17 + $0xc] sm:$0x1] %vm250_vm2, %v566_v26  ;;  %v589_v43 = vrot.slane %v588_v29, 1  ;;  %v624_v44 = vrot.slane %v623_v30, 2  ;;  %v640_v45 = vrot.slane %v639_v31, 4  ;;  %v671_v48 = vsel %vm596_vm3, %v1028_v25, -inf }
  0x60   : > { %v608_v50 = vrot.slane %v607_v36, 1  ;;  %v657_v51 = vmax.f32 %v655_v37, %v656_v38  ;;  %v672_v54 = vsel %vm596_vm3, %v1029_v32, -inf  ;;  %v673_v6 = vsel %vm596_vm3, %v1030_v33, -inf  ;;  %v1044_v25 = vld [vmem:[%s1161_s13 + $0x90] sm:$0xf] }
  0x61   : > { %v590_v27 = vmax.f32 %v588_v29, %v589_v43  ;;  %v625_v13 = vmax.f32 %v623_v30, %v624_v44  ;;  %v641_v20 = vmax.f32 %v639_v31, %v640_v45  ;;  %v674_v34 = vmax.f32 %v670_v39, %v671_v48  ;;  %v1045_v32 = vld [vmem:[%s1161_s13 + $0xa0] sm:$0xf]  ;;  %v1046_v39 = vld [vmem:[%s1161_s13 + $0xb0] sm:$0xf] }
  0x62   : > { %v609_v7 = vmax.f32 %v607_v36, %v608_v50  ;;  %v658_v28 = vrot.slane %v657_v51, 4  ;;  %v675_v46 = vmax.f32 %v672_v54, %v673_v6  ;;  %v688_v55 = vsel %vm596_vm3, %v1031_v42, -inf  ;;  %v1047_v54 = vld [vmem:[%s1161_s13 + $0x84] sm:$0xf]  ;;  %v1048_v6 = vld [vmem:[%s1161_s13 + $0x94] sm:$0xf] }
  0x63   : > { %591 = vst.msk [vmem:[%s1329_s17 + $0xd] sm:$0x1] %vm250_vm2, %v590_v27  ;;  %v626_v14 = vrot.slane %v625_v13, 1  ;;  %v642_v41 = vrot.slane %v641_v20, 2  ;;  %v689_v56 = vsel %vm596_vm3, %v1032_v49, -inf  ;;  %v690_v57 = vsel %vm596_vm3, %v1033_v8, -inf }
  0x64   : > { %610 = vst.msk [vmem:[%s1329_s17 + $0xe] sm:$0x1] %vm250_vm2, %v609_v7  ;;  %v659_v47 = vmax.f32 %v657_v51, %v658_v28  ;;  %v676_v52 = vmax.f32 %v674_v34, %v675_v46  ;;  %v691_v58 = vsel %vm596_vm3, %v1034_v40, -inf  ;;  %v692_v60 = vmax.f32 %v688_v55, %v689_v56  ;;  %v1049_v34 = vld [vmem:[%s1161_s13 + $0xa4] sm:$0xf] }
  0x65   : > { %v627_v62 = vmax.f32 %v625_v13, %v626_v14  ;;  %v643_v63 = vmax.f32 %v641_v20, %v642_v41  ;;  %v693_v0 = vmax.f32 %v690_v57, %v691_v58  ;;  %v706_v2 = vsel %vm596_vm3, %v1035_v12, -inf  ;;  %v1050_v55 = vld [vmem:[%s1161_s13 + $0xb4] sm:$0xf]  ;;  %v1051_v56 = vld [vmem:[%s1161_s13 + $0x88] sm:$0xf] }
  0x66   : > { %v660_v59 = vrot.slane %v659_v47, 2  ;;  %v677_v1 = vrot.slane %v676_v52, 4  ;;  %v707_v4 = vsel %vm596_vm3, %v1036_v35, -inf  ;;  %v708_v5 = vsel %vm596_vm3, %v1037_v21, -inf  ;;  %v1052_v58 = vld [vmem:[%s1161_s13 + $0x98] sm:$0xf] }
  0x67   : > { %628 = vst.msk [vmem:[%s1329_s17 + $0xf] sm:$0x1] %vm250_vm2, %v627_v62  ;;  %v644_v11 = vrot.slane %v643_v63, 1  ;;  %v694_v15 = vmax.f32 %v692_v60, %v693_v0  ;;  %v709_v10 = vsel %vm596_vm3, %v1038_v61, -inf  ;;  %v710_v16 = vmax.f32 %v706_v2, %v707_v4  ;;  %v1053_v60 = vld [vmem:[%s1161_s13 + $0xa8] sm:$0xf] }
  0x68   : > { %v661_v18 = vmax.f32 %v659_v47, %v660_v59  ;;  %v678_v19 = vmax.f32 %v676_v52, %v677_v1  ;;  %v711_v22 = vmax.f32 %v708_v5, %v709_v10  ;;  %v724_v23 = vsel %vm596_vm3, %v1039_v53, -inf  ;;  %v1054_v2 = vld [vmem:[%s1161_s13 + $0xb8] sm:$0xf]  ;;  %v1055_v4 = vld [vmem:[%s1161_s13 + $0x8c] sm:$0xf] }
  0x69   : > { %v645_v26 = vmax.f32 %v643_v63, %v644_v11  ;;  %v695_v29 = vrot.slane %v694_v15, 4  ;;  %v725_v30 = vsel %vm596_vm3, %v1040_v3, -inf  ;;  %v726_v31 = vsel %vm596_vm3, %v1041_v9, -inf  ;;  %v1056_v10 = vld [vmem:[%s1161_s13 + $0x9c] sm:$0xf] }
  0x6a   : > { %v662_v33 = vrot.slane %v661_v18, 1  ;;  %v679_v36 = vrot.slane %v678_v19, 2  ;;  %v712_v37 = vmax.f32 %v710_v16, %v711_v22  ;;  %v727_v38 = vsel %vm596_vm3, %v1042_v17, -inf  ;;  %v1057_v22 = vld [vmem:[%s1161_s13 + $0xac] sm:$0xf] }
  0x6b   : > { %646 = vst.msk [vmem:[%s1329_s17 + $0x10] sm:$0x1] %vm250_vm2, %v645_v26  ;;  %v696_v42 = vmax.f32 %v694_v15, %v695_v29  ;;  %v728_v43 = vmax.f32 %v724_v23, %v725_v30  ;;  %v729_v44 = vmax.f32 %v726_v31, %v727_v38  ;;  %v742_v45 = vsel %vm596_vm3, %v1043_v24, -inf  ;;  %v1058_v23 = vld [vmem:[%s1161_s13 + $0xbc] sm:$0xf] }
  0x6c   : > { %v663_v48 = vmax.f32 %v661_v18, %v662_v33  ;;  %v680_v49 = vmax.f32 %v678_v19, %v679_v36  ;;  %v713_v50 = vrot.slane %v712_v37, 4  ;;  %v743_v51 = vsel %vm596_vm3, %v1044_v25, -inf  ;;  %v1059_v30 = vld [vmem:[%s1161_s13 + $0xc0] sm:$0xf] }
  0x6d   : > { %v697_v8 = vrot.slane %v696_v42, 2  ;;  %v730_v27 = vmax.f32 %v728_v43, %v729_v44  ;;  %v744_v13 = vsel %vm596_vm3, %v1045_v32, -inf  ;;  %v745_v20 = vsel %vm596_vm3, %v1046_v39, -inf  ;;  %v1061_v44 = vld [vmem:[%s1161_s13 + $0xe0] sm:$0xf] }
  0x6e   : > { %664 = vst.msk [vmem:[%s1329_s17 + $0x11] sm:$0x1] %vm250_vm2, %v663_v48  ;;  %v681_v40 = vrot.slane %v680_v49, 1  ;;  %v714_v7 = vmax.f32 %v712_v37, %v713_v50  ;;  %v746_v28 = vmax.f32 %v742_v45, %v743_v51  ;;  %v747_v46 = vmax.f32 %v744_v13, %v745_v20  ;;  %v1060_v37 = vld [vmem:[%s1161_s13 + $0xd0] sm:$0xf] }
  0x6f   : > { %v698_v12 = vmax.f32 %v696_v42, %v697_v8  ;;  %v731_v35 = vrot.slane %v730_v27, 4  ;;  %v760_v14 = vsel %vm596_vm3, %v1047_v54, -inf  ;;  %v761_v41 = vsel %vm596_vm3, %v1048_v6, -inf  ;;  %v1062_v51 = vld [vmem:[%s1161_s13 + $0xf0] sm:$0xf] }
  0x70   : > { %v682_v57 = vmax.f32 %v680_v49, %v681_v40  ;;  %v715_v21 = vrot.slane %v714_v7, 2  ;;  %v748_v47 = vmax.f32 %v746_v28, %v747_v46  ;;  %v762_v52 = vsel %vm596_vm3, %v1049_v34, -inf  ;;  %v1063_v54 = vld [vmem:[%s1161_s13 + $0xc4] sm:$0xf]  ;;  %v1064_v6 = vld [vmem:[%s1161_s13 + $0xd4] sm:$0xf] }
  0x71   : > { %v699_v61 = vrot.slane %v698_v12, 1  ;;  %v732_v62 = vmax.f32 %v730_v27, %v731_v35  ;;  %v763_v63 = vsel %vm596_vm3, %v1050_v55, -inf  ;;  %v764_v0 = vmax.f32 %v760_v14, %v761_v41  ;;  %v1065_v34 = vld [vmem:[%s1161_s13 + $0xe4] sm:$0xf]  ;;  %v1066_v55 = vld [vmem:[%s1161_s13 + $0xf4] sm:$0xf] }
  0x72   : > { %683 = vst.msk [vmem:[%s1329_s17 + $0x12] sm:$0x1] %vm250_vm2, %v682_v57  ;;  %v716_v53 = vmax.f32 %v714_v7, %v715_v21  ;;  %v749_v3 = vrot.slane %v748_v47, 4  ;;  %v765_v59 = vmax.f32 %v762_v52, %v763_v63  ;;  %v778_v1 = vsel %vm596_vm3, %v1051_v56, -inf  ;;  %v1067_v52 = vld [vmem:[%s1161_s13 + $0xc8] sm:$0xf] }
  0x73   : > { %v700_v5 = vmax.f32 %v698_v12, %v699_v61  ;;  %v733_v9 = vrot.slane %v732_v62, 2  ;;  %v779_v11 = vsel %vm596_vm3, %v1052_v58, -inf  ;;  %v780_v15 = vsel %vm596_vm3, %v1053_v60, -inf  ;;  %v1068_v58 = vld [vmem:[%s1161_s13 + $0xd8] sm:$0xf] }
  0x74   : > { %v717_v16 = vrot.slane %v716_v53, 1  ;;  %v750_v17 = vmax.f32 %v748_v47, %v749_v3  ;;  %v766_v18 = vmax.f32 %v764_v0, %v765_v59  ;;  %v781_v19 = vsel %vm596_vm3, %v1054_v2, -inf  ;;  %v1069_v0 = vld [vmem:[%s1161_s13 + $0xe8] sm:$0xf] }
  0x75   : > { %701 = vst.msk [vmem:[%s1329_s17 + $0x13] sm:$0x1] %vm250_vm2, %v700_v5  ;;  %v734_v24 = vmax.f32 %v732_v62, %v733_v9  ;;  %v782_v25 = vmax.f32 %v778_v1, %v779_v11  ;;  %v783_v26 = vmax.f32 %v780_v15, %v781_v19  ;;  %v796_v29 = vsel %vm596_vm3, %v1055_v4, -inf  ;;  %v1070_v1 = vld [vmem:[%s1161_s13 + $0xf8] sm:$0xf] }
  0x76   : > { %v718_v31 = vmax.f32 %v716_v53, %v717_v16  ;;  %v751_v32 = vrot.slane %v750_v17, 2  ;;  %v767_v33 = vrot.slane %v766_v18, 4  ;;  %v797_v36 = vsel %vm596_vm3, %v1056_v10, -inf  ;;  %v1071_v15 = vld [vmem:[%s1161_s13 + $0xcc] sm:$0xf] }
  0x77   : > { %v735_v38 = vrot.slane %v734_v24, 1  ;;  %v784_v39 = vmax.f32 %v782_v25, %v783_v26  ;;  %v798_v42 = vsel %vm596_vm3, %v1057_v22, -inf  ;;  %v799_v43 = vsel %vm596_vm3, %v1058_v23, -inf  ;;  %v1072_v10 = vld [vmem:[%s1161_s13 + $0xdc] sm:$0xf] }
  0x78   : > { %719 = vst.msk [vmem:[%s1329_s17 + $0x14] sm:$0x1] %vm250_vm2, %v718_v31  ;;  %v752_v45 = vmax.f32 %v750_v17, %v751_v32  ;;  %v768_v48 = vmax.f32 %v766_v18, %v767_v33  ;;  %v800_v49 = vmax.f32 %v796_v29, %v797_v36  ;;  %v801_v50 = vmax.f32 %v798_v42, %v799_v43  ;;  %v1073_v22 = vld [vmem:[%s1161_s13 + $0xec] sm:$0xf]  ;;  %v1074_v29 = vld [vmem:[%s1161_s13 + $0xfc] sm:$0xf] }
  0x79   : > { %v736_v8 = vmax.f32 %v734_v24, %v735_v38  ;;  %v785_v27 = vrot.slane %v784_v39, 4  ;;  %v815_v13 = vsel %vm596_vm3, %v1059_v30, -inf  ;;  %v816_v20 = vsel %vm596_vm3, %v1060_v37, -inf }
  0x7a   : > { %v753_v40 = vrot.slane %v752_v45, 1  ;;  %v769_v7 = vrot.slane %v768_v48, 2  ;;  %v802_v28 = vmax.f32 %v800_v49, %v801_v50  ;;  %v817_v46 = vsel %vm596_vm3, %v1061_v44, -inf }
  0x7b   : > { %737 = vst.msk [vmem:[%s1329_s17 + $0x15] sm:$0x1] %vm250_vm2, %v736_v8  ;;  %v786_v12 = vmax.f32 %v784_v39, %v785_v27  ;;  %v818_v35 = vsel %vm596_vm3, %v1062_v51, -inf  ;;  %v819_v14 = vmax.f32 %v815_v13, %v816_v20  ;;  %v833_v41 = vsel %vm596_vm3, %v1063_v54, -inf }
  0x7c   : > { %v754_v56 = vmax.f32 %v752_v45, %v753_v40  ;;  %v770_v57 = vmax.f32 %v768_v48, %v769_v7  ;;  %v803_v21 = vrot.slane %v802_v28, 4  ;;  %v820_v47 = vmax.f32 %v817_v46, %v818_v35 }
  0x7d   : > { %v787_v60 = vrot.slane %v786_v12, 2  ;;  %v834_v61 = vsel %vm596_vm3, %v1064_v6, -inf  ;;  %v835_v62 = vsel %vm596_vm3, %v1065_v34, -inf  ;;  %v836_v63 = vsel %vm596_vm3, %v1066_v55, -inf }
  0x7e   : > { %755 = vst.msk [vmem:[%s1329_s17 + $0x16] sm:$0x1] %vm250_vm2, %v754_v56  ;;  %v771_v2 = vrot.slane %v770_v57, 1  ;;  %v804_v53 = vmax.f32 %v802_v28, %v803_v21  ;;  %v821_v3 = vmax.f32 %v819_v14, %v820_v47  ;;  %v837_v59 = vmax.f32 %v833_v41, %v834_v61 }
  0x7f   : > { %v788_v4 = vmax.f32 %v786_v12, %v787_v60  ;;  %v838_v5 = vmax.f32 %v835_v62, %v836_v63  ;;  %v851_v9 = vsel %vm596_vm3, %v1067_v52, -inf  ;;  %v852_v11 = vsel %vm596_vm3, %v1068_v58, -inf }
  0x80   : > { %v772_v16 = vmax.f32 %v770_v57, %v771_v2  ;;  %v805_v17 = vrot.slane %v804_v53, 2  ;;  %v822_v18 = vrot.slane %v821_v3, 4  ;;  %v853_v19 = vsel %vm596_vm3, %v1069_v0, -inf }
  0x81   : > { %v789_v23 = vrot.slane %v788_v4, 1  ;;  %v839_v24 = vmax.f32 %v837_v59, %v838_v5  ;;  %v854_v25 = vsel %vm596_vm3, %v1070_v1, -inf  ;;  %v855_v26 = vmax.f32 %v851_v9, %v852_v11 }
  0x82   : > { %773 = vst.msk [vmem:[%s1329_s17 + $0x17] sm:$0x1] %vm250_vm2, %v772_v16  ;;  %v806_v30 = vmax.f32 %v804_v53, %v805_v17  ;;  %v823_v31 = vmax.f32 %v821_v3, %v822_v18  ;;  %v856_v32 = vmax.f32 %v853_v19, %v854_v25  ;;  %v869_v33 = vsel %vm596_vm3, %v1071_v15, -inf }
  0x83   : > { %v790_v36 = vmax.f32 %v788_v4, %v789_v23  ;;  %v840_v37 = vrot.slane %v839_v24, 4  ;;  %v870_v38 = vsel %vm596_vm3, %v1072_v10, -inf  ;;  %v871_v39 = vsel %vm596_vm3, %v1073_v22, -inf }
  0x84   : > { %v807_v42 = vrot.slane %v806_v30, 1  ;;  %v824_v43 = vrot.slane %v823_v31, 2  ;;  %v857_v44 = vmax.f32 %v855_v26, %v856_v32  ;;  %v872_v45 = vsel %vm596_vm3, %v1074_v29, -inf }
  0x85   : > { %791 = vst.msk [vmem:[%s1329_s17 + $0x18] sm:$0x1] %vm250_vm2, %v790_v36  ;;  %v841_v48 = vmax.f32 %v839_v24, %v840_v37  ;;  %v873_v49 = vmax.f32 %v869_v33, %v870_v38  ;;  %v874_v50 = vmax.f32 %v871_v39, %v872_v45 }
  0x86   : > { %v808_v51 = vmax.f32 %v806_v30, %v807_v42  ;;  %v825_v54 = vmax.f32 %v823_v31, %v824_v43  ;;  %v858_v6 = vrot.slane %v857_v44, 4 }
  0x87   : > { %v842_v8 = vrot.slane %v841_v48, 2  ;;  %v875_v27 = vmax.f32 %v873_v49, %v874_v50 }
  0x88   : > { %809 = vst.msk [vmem:[%s1329_s17 + $0x19] sm:$0x1] %vm250_vm2, %v808_v51  ;;  %v826_v13 = vrot.slane %v825_v54, 1  ;;  %v859_v20 = vmax.f32 %v857_v44, %v858_v6 }
  0x89   : > { %v843_v34 = vmax.f32 %v841_v48, %v842_v8  ;;  %v876_v40 = vrot.slane %v875_v27, 4 }
  0x8a   : > { %v827_v7 = vmax.f32 %v825_v54, %v826_v13  ;;  %v860_v28 = vrot.slane %v859_v20, 2 }
  0x8b   : > { %v844_v46 = vrot.slane %v843_v34, 1  ;;  %v877_v55 = vmax.f32 %v875_v27, %v876_v40 }
  0x8c   : > { %828 = vst.msk [vmem:[%s1329_s17 + $0x1a] sm:$0x1] %vm250_vm2, %v827_v7  ;;  %v861_v12 = vmax.f32 %v859_v20, %v860_v28 }
  0x8d   : > { %v845_v35 = vmax.f32 %v843_v34, %v844_v46  ;;  %v878_v14 = vrot.slane %v877_v55, 2 }
  0x8e   : > { %v862_v41 = vrot.slane %v861_v12, 1 }
  0x8f   : > { %846 = vst.msk [vmem:[%s1329_s17 + $0x1b] sm:$0x1] %vm250_vm2, %v845_v35  ;;  %v879_v56 = vmax.f32 %v877_v55, %v878_v14 }
  0x90   : > { %v863_v57 = vmax.f32 %v861_v12, %v862_v41 }
  0x91   : > { %v880_v21 = vrot.slane %v879_v56, 1 }
  0x92   : > { %864 = vst.msk [vmem:[%s1329_s17 + $0x1c] sm:$0x1] %vm250_vm2, %v863_v57 }
  0x93   : > { %v881_v47 = vmax.f32 %v879_v56, %v880_v21 }
  0x95   : > { %882 = vst.msk [vmem:[%s1329_s17 + $0x1d] sm:$0x1] %vm250_vm2, %v881_v47 }
  0x96 PF: > { %s11_s8 = sadd.s32 1, %s1125_s8   ;;  %s1620_s6 = smov %s1121_s7 }
  0x97   : > { %p8_p5 = scmp.ge.s32.totalorder %s11_s8, 4   ;;  %s1621_s7 = smov %s1623_s9 }
  0x99   :  { %10 = sbr.rel (!%p8_p5) target bundleno = 2 (0x2), region = 59 }

</bundles_post_ra>
